<compile_context>
chip_gen: v7x
topology: tpu7x:2x2x1
jax: 0.10.0
libtpu: 0.0.40
codegen_flags: <defaults>
</compile_context>

<pallas_src>
import jax
import jax.numpy as jnp
from jax import lax
from jax.experimental import pallas as pl
from jax.experimental.pallas import tpu as pltpu


# ---------------------------------------------------------------------------
# Fused sequence kernel: all `steps` time steps in one pallas_call, grid=(steps,).
# ---------------------------------------------------------------------------
def _make_fused_kernel(C, H, W, N):
    HW = H * W
    NHW = N * HW

    def fill_stack(stack_ref, v, mask_ref):
        """Write the 9-tap im2col stack of v (shape (C, N*HW)) into stack_ref.

        stack_ref[(kh*3+kw)*C + ci, n*HW + p] = v[ci, n*HW + p + dh*W + dw]
        (zero where the tap falls outside the HxW image), matching the
        (kh, kw, ci, co) flattening of the conv weights.
        """
        k = 0
        for dh in (-1, 0, 1):
            for dw in (-1, 0, 1):
                sh = dh * W + dw
                if sh == 0:
                    sv = v                                    # centre tap: always in-bounds
                else:
                    sv = pltpu.roll(v, shift=(-sh) % NHW, axis=1) * mask_ref[k]
                stack_ref[pl.ds(k * C, C), :] = sv
                k += 1

    def kernel(mask_ref, wpT_ref, wxT_ref, bias_ref, x_ref,       # inputs
               out_ref, s_ref, sg_ref,                            # per-step outputs
               prev_ref, cum_ref, sp_ref, sx_ref):                # persistent VMEM scratch
        t = pl.program_id(0)

        # Carried state lives in VMEM across grid steps; initialise at t == 0.
        @pl.when(t == 0)
        def _():
            prev_ref[...] = jnp.zeros_like(prev_ref)
            cum_ref[...] = jnp.zeros_like(cum_ref)

        # Build the shifted stacks for both conv sources (previous spikes, current x).
        fill_stack(sp_ref, prev_ref[...], mask_ref)
        fill_stack(sx_ref, x_ref[0], mask_ref)

        # All MAC work on the MXU: one (2C x 9C) @ (9C x N*H*W) matmul per source.
        # Rows 0..C-1 of y are the z path (conv + shortcut, BN folded), rows C..2C-1
        # the gate path (convg + shortcutg, BN folded); bias_ref is the folded BN bias.
        y = (jnp.dot(wpT_ref[0], sp_ref[...], preferred_element_type=jnp.float32)
             + jnp.dot(wxT_ref[0], sx_ref[...], preferred_element_type=jnp.float32)
             + bias_ref[0])

        s = jnp.maximum(y[:C, :], 0.0)                      # relu(z)
        g = 0.5 * (jnp.tanh(0.5 * y[C:, :]) + 1.0)          # sigmoid via EUP tanh (stable)

        cum = cum_ref[...] + s                              # running sum of relu outputs
        out_ref[0] = cum
        s_ref[0] = s
        sg_ref[0] = s * g
        cum_ref[...] = cum
        prev_ref[...] = s

        @pl.when(t == 0)
        def _():
            sg_ref[0] = s                                   # gate == 1 at the first step

    return kernel


def _build_fused_call(steps, C, H, W, N):
    NHW = N * H * W
    kernel = _make_fused_kernel(C, H, W, N)
    tens = jax.ShapeDtypeStruct((steps, C, NHW), jnp.float32)
    step_spec = pl.BlockSpec((1, C, NHW), lambda t: (t, 0, 0))
    return pl.pallas_call(
        kernel,
        out_shape=(tens, tens, tens),                       # out, s (lastresult), s*g (lastg)
        grid_spec=pltpu.PrefetchScalarGridSpec(
            num_scalar_prefetch=0,
            grid=(steps,),
            in_specs=[
                # Edge masks: constant index_map -> DMA'd once, VMEM-resident for all steps.
                pl.BlockSpec((9, C, NHW), lambda t: (0, 0, 0)),
                pl.BlockSpec((1, 2 * C, 9 * C), lambda t: (t, 0, 0)),   # W_prev^T (BN folded)
                pl.BlockSpec((1, 2 * C, 9 * C), lambda t: (t, 0, 0)),   # W_x^T    (BN folded)
                pl.BlockSpec((1, 2 * C, NHW), lambda t: (t, 0, 0)),     # folded BN bias
                step_spec,                                              # x_t
            ],
            out_specs=[step_spec, step_spec, step_spec],
            scratch_shapes=[
                pltpu.VMEM((C, NHW), jnp.float32),            # prev spikes s_{t-1}
                pltpu.VMEM((C, NHW), jnp.float32),            # running sum of spikes
                pltpu.VMEM((9 * C, NHW), jnp.float32),        # shifted stack of prev
                pltpu.VMEM((9 * C, NHW), jnp.float32),        # shifted stack of x_t
            ],
        ),
        # The step axis carries prev/cum state -> must stay sequential ("arbitrary").
        # TODO(synk): on v7x a second 'parallel' batch axis could use both TensorCores,
        # but at N=2 the per-core grid overhead outweighs the gain.
        compiler_params=pltpu.CompilerParams(dimension_semantics=("arbitrary",)),
    )


# ---------------------------------------------------------------------------
# Host-side parameter folding (eval-mode BatchNorm folded into conv weights).
# ---------------------------------------------------------------------------
def _conv_mat(w_oihw):
    """OIHW 3x3 conv weight -> (9*Cin, Cout) matrix, row index = (kh*3+kw)*Cin + ci."""
    C_out = w_oihw.shape[0]
    return jnp.transpose(w_oihw, (2, 3, 1, 0)).reshape(-1, C_out)


def _fold_conv_bn(w_oihw, bn, eps):
    """Fold eval-mode BN into the conv-matrix columns; returns (matrix, bias)."""
    gamma, beta, mean, var = bn
    scale = gamma / jnp.sqrt(var + eps)
    return _conv_mat(w_oihw) * scale[None, :], beta - mean * scale


class SpikingRCLbnadd4:
    """Stateful JAX/Pallas port of braincog's SpikingRCLbnadd4 (inference-mode BN)."""

    def __init__(self, inplanes, steps=4, *, key, eps=1e-5):
        self.inplanes = int(inplanes)
        self.steps = int(steps)
        self.eps = float(eps)

        C = self.inplanes
        ks = jax.random.split(key, 4 + 4 * steps)
        std = (2.0 / (3 * 3 * C)) ** 0.5                     # PyTorch init N(0, sqrt(2/n))

        def conv_w(k):
            return std * jax.random.normal(k, (C, C, 3, 3), jnp.float32)   # OIHW

        def bn_params(k):
            # Randomised (non-identity) BN stats so the host-side fold is exercised.
            k0, k1, k2, k3 = jax.random.split(k, 4)
            gamma = 1.0 + 0.1 * jax.random.normal(k0, (C,), jnp.float32)
            beta = 0.1 * jax.random.normal(k1, (C,), jnp.float32)
            mean = 0.1 * jax.random.normal(k2, (C,), jnp.float32)
            var = 1.0 + 0.1 * jnp.abs(jax.random.normal(k3, (C,), jnp.float32))
            return gamma, beta, mean, var

        self.params = {
            "conv": conv_w(ks[0]),
            "convg": conv_w(ks[1]),
            "shortcut": conv_w(ks[2]),
            "shortcutg": conv_w(ks[3]),
            "bn": [bn_params(ks[4 + 0 * steps + t]) for t in range(steps)],
            "bn2": [bn_params(ks[4 + 1 * steps + t]) for t in range(steps)],
            "bng": [bn_params(ks[4 + 2 * steps + t]) for t in range(steps)],
            "bng2": [bn_params(ks[4 + 3 * steps + t]) for t in range(steps)],
            # The PyTorch module also creates `bn22`, which forward never uses.
        }

        # Fold BN into the conv weights once and stack per-step params:
        #   wpT[t] : (2C, 9C)  weights applied to the previous spike map
        #   wxT[t] : (2C, 9C)  weights applied to the current input
        #   bias[t]: (2C,)     folded BN bias (z path then gate path)
        p = self.params
        wpT = [jnp.zeros((2 * C, 9 * C), jnp.float32)]
        wxT = [jnp.concatenate([_conv_mat(p["shortcut"]),
                                jnp.zeros((9 * C, C), jnp.float32)], axis=1).T]
        bias = [jnp.zeros((2 * C,), jnp.float32)]
        for t in range(1, steps):
            mzp, bzp = _fold_conv_bn(p["conv"], p["bn"][t], eps)
            mgp, bgp = _fold_conv_bn(p["convg"], p["bng"][t], eps)
            mzx, bzx = _fold_conv_bn(p["shortcut"], p["bn2"][t], eps)
            mgx, bgx = _fold_conv_bn(p["shortcutg"], p["bng2"][t], eps)
            wpT.append(jnp.concatenate([mzp, mgp], axis=1).T)
            wxT.append(jnp.concatenate([mzx, mgx], axis=1).T)
            bias.append(jnp.concatenate([bzp + bzx, bgp + bgx]))
        self._wpT = jnp.stack(wpT).astype(jnp.float32)       # (steps, 2C, 9C)
        self._wxT = jnp.stack(wxT).astype(jnp.float32)       # (steps, 2C, 9C)
        self._bias = jnp.stack(bias).astype(jnp.float32)     # (steps, 2C)

        self._runner_cache = {}
        self.n_reset()

    # ----------------------------------------------------------------- state
    def n_reset(self):
        self.i = 0
        self.lastresult = []
        self.lastg = []
        self._xbuf = []

    # ------------------------------------------------------------- compile
    def _get_runner(self, N, H, W):
        key = (int(N), int(H), int(W))
        if key in self._runner_cache:
            return self._runner_cache[key]

        C, steps = self.inplanes, self.steps
        HW, NHW = H * W, N * H * W

        # Host-precomputed edge masks, tap order (dh, dw) row-major (matches weights).
        pos = jnp.arange(HW)
        row, col = pos // W, pos % W
        m = []
        for dh in (-1, 0, 1):
            for dw in (-1, 0, 1):
                ok = ((row + dh >= 0) & (row + dh < H) &
                      (col + dw >= 0) & (col + dw < W))
                m.append(jnp.tile(ok.astype(jnp.float32), N))          # (N*HW,)
        masks = jnp.broadcast_to(jnp.stack(m)[:, None, :], (9, C, NHW))
        bias_b = jnp.broadcast_to(self._bias[:, :, None], (steps, 2 * C, NHW))

        call = _build_fused_call(steps, C, H, W, N)
        wpT, wxT = self._wpT, self._wxT

        @jax.jit
        def run(xs):                       # xs: (steps, N, C, H, W)
            xf = jnp.transpose(xs.astype(jnp.float32),
                               (0, 2, 1, 3, 4)).reshape(steps, C, NHW)
            out, s, sg = call(masks, wpT, wxT, bias_b, xf)

            def back(a):
                return jnp.transpose(a.reshape(steps, C, N, H, W), (0, 2, 1, 3, 4))

            return back(out), back(s), back(sg)

        self._runner_cache[key] = run
        return run

    # --------------------------------------------------------------- forward
    def forward_sequence(self, xs):
        """Fast path: run all `steps` time steps in ONE fused pallas_call.

        xs: (steps, N, C, H, W) array or list of `steps` (N, C, H, W) arrays.
        Returns (outs, s, s*g), each (steps, N, C, H, W).
        """
        if isinstance(xs, (list, tuple)):
            xs = jnp.stack(xs, axis=0)
        steps, N, C, H, W = xs.shape
        assert steps == self.steps and C == self.inplanes
        run = self._get_runner(N, H, W)
        outs, s_all, sg_all = run(xs)
        self.i = self.steps
        self._xbuf = [xs[t] for t in range(self.steps)]
        self.lastresult = [s_all[t] for t in range(self.steps)]
        self.lastg = [sg_all[t] for t in range(self.steps)]
        return outs, s_all, sg_all

    def forward(self, x_nchw):
        """Per-call stateful API matching the PyTorch module (one x per time step).

        Re-runs the fused kernel over the padded sequence seen so far (one compiled
        kernel, deterministic prefix recomputation - cheap at these sizes)."""
        N, C, H, W = x_nchw.shape
        assert C == self.inplanes
        assert self.i < self.steps, "call n_reset() after `steps` forward calls"
        self._xbuf.append(jnp.asarray(x_nchw, jnp.float32))
        run = self._get_runner(N, H, W)
        pad = [jnp.zeros_like(self._xbuf[0])] * (self.steps - len(self._xbuf))
        outs, s_all, sg_all = run(jnp.stack(self._xbuf + pad, axis=0))
        i = self.i
        self.lastresult = [s_all[t] for t in range(i + 1)]
        self.lastg = [sg_all[t] for t in range(i + 1)]
        self.i += 1
        return outs[i]

    __call__ = forward


# ---------------------------------------------------------------------------
# Pure-JAX reference (same math as the PyTorch forward, eval-mode BN).
# ---------------------------------------------------------------------------
def _reference_forward_sequence(params, xs, eps=1e-5):
    def conv(x, w_oihw):
        return lax.conv_general_dilated(
            x, jnp.transpose(w_oihw, (2, 3, 1, 0)), (1, 1), ((1, 1), (1, 1)),
            dimension_numbers=("NCHW", "HWIO", "NCHW"),
            precision=lax.Precision.HIGHEST)

    def bn(x, p):
        gamma, beta, mean, var = (v[None, :, None, None] for v in p)
        return (x - mean) / jnp.sqrt(var + eps) * gamma + beta

    lastresult, lastg, outs = [], [], []
    for i, x in enumerate(xs):
        x = x.astype(jnp.float32)
        if i == 0:
            z = conv(x, params["shortcut"])
            g = 1.0
        else:
            g = jax.nn.sigmoid(bn(conv(lastresult[-1], params["convg"]), params["bng"][i])
                               + bn(conv(x, params["shortcutg"]), params["bng2"][i]))
            z = (bn(conv(lastresult[-1], params["conv"]), params["bn"][i])
                 + bn(conv(x, params["shortcut"]), params["bn2"][i]))
        s = jnp.maximum(z, 0.0)
        lastresult.append(s)
        lastg.append(s * g)
        outs.append(jnp.stack(lastresult).sum(0))
    return outs, lastg


if __name__ == "__main__":
    key = jax.random.PRNGKey(0)
    k_mod, k_x = jax.random.split(key)

    N, C, H, W = 2, 4, 16, 16
    steps = 4

    module = SpikingRCLbnadd4(C, steps=steps, key=k_mod)
    xs = [jax.random.normal(k, (N, C, H, W), jnp.float32)
          for k in jax.random.split(k_x, steps)]

    # --- fused whole-sequence path: one pallas_call for all steps ---
    outs, s_all, sg_all = module.forward_sequence(xs)
    outs = jax.block_until_ready(outs)

    ref_outs, ref_lastg = _reference_forward_sequence(module.params, xs)

    # Tolerance sized for the case where the backend lowers the f32 MXU contraction
    # with bf16 operand rounding (default matmul precision); with full-f32 MXU
    # passes the observed error is ~1e-6.
    TOL = dict(atol=2e-2, rtol=2e-2)
    for t in range(steps):
        assert outs[t].shape == (N, C, H, W)
        assert jnp.allclose(outs[t], ref_outs[t], **TOL), \
            f"step {t}: output mismatch vs reference"
        assert jnp.allclose(sg_all[t], ref_lastg[t], **TOL), \
            f"step {t}: gated-state (lastg) mismatch vs reference"

    # --- stateful per-call API (same fused kernel, prefix re-run) ---
    module.n_reset()
    for t in range(steps):
        o = module(xs[t])
        assert jnp.allclose(o, ref_outs[t], **TOL), \
            f"step {t}: stateful output mismatch vs reference"

    print("KERNEL_OK")
</pallas_src>

<mosaic_0001>
module attributes {stable_mosaic.version = 11 : i64} {
  func.func @kernel(%arg0: i32, %arg1: memref<9x4x512xf32, #tpu.memory_space<vmem>>, %arg2: memref<1x8x36xf32, #tpu.memory_space<vmem>>, %arg3: memref<1x8x36xf32, #tpu.memory_space<vmem>>, %arg4: memref<1x8x512xf32, #tpu.memory_space<vmem>>, %arg5: memref<1x4x512xf32, #tpu.memory_space<vmem>>, %arg6: memref<1x4x512xf32, #tpu.memory_space<vmem>>, %arg7: memref<1x4x512xf32, #tpu.memory_space<vmem>>, %arg8: memref<1x4x512xf32, #tpu.memory_space<vmem>>, %arg9: memref<4x512xf32, #tpu.memory_space<vmem>>, %arg10: memref<4x512xf32, #tpu.memory_space<vmem>>, %arg11: memref<36x512xf32, #tpu.memory_space<vmem>>, %arg12: memref<36x512xf32, #tpu.memory_space<vmem>>) attributes {dimension_semantics = [#tpu.dimension_semantics<arbitrary>], iteration_bounds = array<i64: 4>, scalar_prefetch = 0 : i64, scratch_operands = 4 : i64, tpu.core_type = #tpu.core_type<tc>, window_params = [{pipeline_mode = #tpu.pipeline_mode<synchronous>, transform_indices = @transform_0, window_bounds = array<i64: 9, 4, 512>}, {transform_indices = @transform_1, window_bounds = array<i64: 1, 8, 36>}, {transform_indices = @transform_2, window_bounds = array<i64: 1, 8, 36>}, {transform_indices = @transform_3, window_bounds = array<i64: 1, 8, 512>}, {transform_indices = @transform_4, window_bounds = array<i64: 1, 4, 512>}, {transform_indices = @transform_5, window_bounds = array<i64: 1, 4, 512>}, {transform_indices = @transform_6, window_bounds = array<i64: 1, 4, 512>}, {transform_indices = @transform_7, window_bounds = array<i64: 1, 4, 512>}]} {
    %c0_i32 = arith.constant 0 : i32
    %0 = arith.cmpi eq, %arg0, %c0_i32 : i32
    %1 = arith.extui %0 : i1 to i32
    %c0_i32_0 = arith.constant 0 : i32
    %2 = arith.cmpi ne, %1, %c0_i32_0 : i32
    scf.if %2 {
      %cst_118 = arith.constant 0.000000e+00 : f32
      %128 = vector.broadcast %cst_118 : f32 to vector<4x512xf32>
      %c0_119 = arith.constant 0 : index
      %c0_120 = arith.constant 0 : index
      %129 = vector.load %arg9[%c0_119, %c0_120] : memref<4x512xf32, #tpu.memory_space<vmem>>, vector<4x512xf32>
      tpu.vector_store %arg9[%c0_119, %c0_120], %128 {strides = array<i32>} : memref<4x512xf32, #tpu.memory_space<vmem>>, vector<4x512xf32>,
      %cst_121 = arith.constant 0.000000e+00 : f32
      %130 = vector.broadcast %cst_121 : f32 to vector<4x512xf32>
      %c0_122 = arith.constant 0 : index
      %c0_123 = arith.constant 0 : index
      %131 = vector.load %arg10[%c0_122, %c0_123] : memref<4x512xf32, #tpu.memory_space<vmem>>, vector<4x512xf32>
      tpu.vector_store %arg10[%c0_122, %c0_123], %130 {strides = array<i32>} : memref<4x512xf32, #tpu.memory_space<vmem>>, vector<4x512xf32>,
    } else {
    }
    %c0 = arith.constant 0 : index
    %c0_1 = arith.constant 0 : index
    %3 = vector.load %arg9[%c0, %c0_1] : memref<4x512xf32, #tpu.memory_space<vmem>>, vector<4x512xf32>
    %c17_i32 = arith.constant 17 : i32
    %4 = tpu.dynamic_rotate %3 by %c17_i32 dim 1 : vector<4x512xf32>, i32 -> vector<4x512xf32>
    %c0_2 = arith.constant 0 : index
    %c0_3 = arith.constant 0 : index
    %c0_4 = arith.constant 0 : index
    %5 = vector.load %arg1[%c0_2, %c0_3, %c0_4] : memref<9x4x512xf32, #tpu.memory_space<vmem>>, vector<1x4x512xf32>
    %6 = vector.shape_cast %5 : vector<1x4x512xf32> to vector<4x512xf32>
    %7 = arith.mulf %4, %6 : vector<4x512xf32>
    %c0_5 = arith.constant 0 : index
    %c0_6 = arith.constant 0 : index
    %8 = vector.load %arg11[%c0_5, %c0_6] : memref<36x512xf32, #tpu.memory_space<vmem>>, vector<4x512xf32>
    tpu.vector_store %arg11[%c0_5, %c0_6], %7 {strides = array<i32>} : memref<36x512xf32, #tpu.memory_space<vmem>>, vector<4x512xf32>,
    %c16_i32 = arith.constant 16 : i32
    %9 = tpu.dynamic_rotate %3 by %c16_i32 dim 1 : vector<4x512xf32>, i32 -> vector<4x512xf32>
    %c1 = arith.constant 1 : index
    %c0_7 = arith.constant 0 : index
    %c0_8 = arith.constant 0 : index
    %10 = vector.load %arg1[%c1, %c0_7, %c0_8] : memref<9x4x512xf32, #tpu.memory_space<vmem>>, vector<1x4x512xf32>
    %11 = vector.shape_cast %10 : vector<1x4x512xf32> to vector<4x512xf32>
    %12 = arith.mulf %9, %11 : vector<4x512xf32>
    %c4 = arith.constant 4 : index
    %c0_9 = arith.constant 0 : index
    %13 = vector.load %arg11[%c4, %c0_9] : memref<36x512xf32, #tpu.memory_space<vmem>>, vector<4x512xf32>
    tpu.vector_store %arg11[%c4, %c0_9], %12 {strides = array<i32>} : memref<36x512xf32, #tpu.memory_space<vmem>>, vector<4x512xf32>,
    %c15_i32 = arith.constant 15 : i32
    %14 = tpu.dynamic_rotate %3 by %c15_i32 dim 1 : vector<4x512xf32>, i32 -> vector<4x512xf32>
    %c2 = arith.constant 2 : index
    %c0_10 = arith.constant 0 : index
    %c0_11 = arith.constant 0 : index
    %15 = vector.load %arg1[%c2, %c0_10, %c0_11] : memref<9x4x512xf32, #tpu.memory_space<vmem>>, vector<1x4x512xf32>
    %16 = vector.shape_cast %15 : vector<1x4x512xf32> to vector<4x512xf32>
    %17 = arith.mulf %14, %16 : vector<4x512xf32>
    %c8 = arith.constant 8 : index
    %c0_12 = arith.constant 0 : index
    %18 = vector.load %arg11[%c8, %c0_12] : memref<36x512xf32, #tpu.memory_space<vmem>>, vector<4x512xf32>
    tpu.vector_store %arg11[%c8, %c0_12], %17 {strides = array<i32>} : memref<36x512xf32, #tpu.memory_space<vmem>>, vector<4x512xf32>,
    %c1_i32 = arith.constant 1 : i32
    %19 = tpu.dynamic_rotate %3 by %c1_i32 dim 1 : vector<4x512xf32>, i32 -> vector<4x512xf32>
    %c3 = arith.constant 3 : index
    %c0_13 = arith.constant 0 : index
    %c0_14 = arith.constant 0 : index
    %20 = vector.load %arg1[%c3, %c0_13, %c0_14] : memref<9x4x512xf32, #tpu.memory_space<vmem>>, vector<1x4x512xf32>
    %21 = vector.shape_cast %20 : vector<1x4x512xf32> to vector<4x512xf32>
    %22 = arith.mulf %19, %21 : vector<4x512xf32>
    %c12 = arith.constant 12 : index
    %c0_15 = arith.constant 0 : index
    %23 = vector.load %arg11[%c12, %c0_15] : memref<36x512xf32, #tpu.memory_space<vmem>>, vector<4x512xf32>
    tpu.vector_store %arg11[%c12, %c0_15], %22 {strides = array<i32>} : memref<36x512xf32, #tpu.memory_space<vmem>>, vector<4x512xf32>,
    %c16 = arith.constant 16 : index
    %c0_16 = arith.constant 0 : index
    %24 = vector.load %arg11[%c16, %c0_16] : memref<36x512xf32, #tpu.memory_space<vmem>>, vector<4x512xf32>
    tpu.vector_store %arg11[%c16, %c0_16], %3 {strides = array<i32>} : memref<36x512xf32, #tpu.memory_space<vmem>>, vector<4x512xf32>,
    %c511_i32 = arith.constant 511 : i32
    %25 = tpu.dynamic_rotate %3 by %c511_i32 dim 1 : vector<4x512xf32>, i32 -> vector<4x512xf32>
    %c5 = arith.constant 5 : index
    %c0_17 = arith.constant 0 : index
    %c0_18 = arith.constant 0 : index
    %26 = vector.load %arg1[%c5, %c0_17, %c0_18] : memref<9x4x512xf32, #tpu.memory_space<vmem>>, vector<1x4x512xf32>
    %27 = vector.shape_cast %26 : vector<1x4x512xf32> to vector<4x512xf32>
    %28 = arith.mulf %25, %27 : vector<4x512xf32>
    %c20 = arith.constant 20 : index
    %c0_19 = arith.constant 0 : index
    %29 = vector.load %arg11[%c20, %c0_19] : memref<36x512xf32, #tpu.memory_space<vmem>>, vector<4x512xf32>
    tpu.vector_store %arg11[%c20, %c0_19], %28 {strides = array<i32>} : memref<36x512xf32, #tpu.memory_space<vmem>>, vector<4x512xf32>,
    %c497_i32 = arith.constant 497 : i32
    %30 = tpu.dynamic_rotate %3 by %c497_i32 dim 1 : vector<4x512xf32>, i32 -> vector<4x512xf32>
    %c6 = arith.constant 6 : index
    %c0_20 = arith.constant 0 : index
    %c0_21 = arith.constant 0 : index
    %31 = vector.load %arg1[%c6, %c0_20, %c0_21] : memref<9x4x512xf32, #tpu.memory_space<vmem>>, vector<1x4x512xf32>
    %32 = vector.shape_cast %31 : vector<1x4x512xf32> to vector<4x512xf32>
    %33 = arith.mulf %30, %32 : vector<4x512xf32>
    %c24 = arith.constant 24 : index
    %c0_22 = arith.constant 0 : index
    %34 = vector.load %arg11[%c24, %c0_22] : memref<36x512xf32, #tpu.memory_space<vmem>>, vector<4x512xf32>
    tpu.vector_store %arg11[%c24, %c0_22], %33 {strides = array<i32>} : memref<36x512xf32, #tpu.memory_space<vmem>>, vector<4x512xf32>,
    %c496_i32 = arith.constant 496 : i32
    %35 = tpu.dynamic_rotate %3 by %c496_i32 dim 1 : vector<4x512xf32>, i32 -> vector<4x512xf32>
    %c7 = arith.constant 7 : index
    %c0_23 = arith.constant 0 : index
    %c0_24 = arith.constant 0 : index
    %36 = vector.load %arg1[%c7, %c0_23, %c0_24] : memref<9x4x512xf32, #tpu.memory_space<vmem>>, vector<1x4x512xf32>
    %37 = vector.shape_cast %36 : vector<1x4x512xf32> to vector<4x512xf32>
    %38 = arith.mulf %35, %37 : vector<4x512xf32>
    %c28 = arith.constant 28 : index
    %c0_25 = arith.constant 0 : index
    %39 = vector.load %arg11[%c28, %c0_25] : memref<36x512xf32, #tpu.memory_space<vmem>>, vector<4x512xf32>
    tpu.vector_store %arg11[%c28, %c0_25], %38 {strides = array<i32>} : memref<36x512xf32, #tpu.memory_space<vmem>>, vector<4x512xf32>,
    %c495_i32 = arith.constant 495 : i32
    %40 = tpu.dynamic_rotate %3 by %c495_i32 dim 1 : vector<4x512xf32>, i32 -> vector<4x512xf32>
    %c8_26 = arith.constant 8 : index
    %c0_27 = arith.constant 0 : index
    %c0_28 = arith.constant 0 : index
    %41 = vector.load %arg1[%c8_26, %c0_27, %c0_28] : memref<9x4x512xf32, #tpu.memory_space<vmem>>, vector<1x4x512xf32>
    %42 = vector.shape_cast %41 : vector<1x4x512xf32> to vector<4x512xf32>
    %43 = arith.mulf %40, %42 : vector<4x512xf32>
    %c32 = arith.constant 32 : index
    %c0_29 = arith.constant 0 : index
    %44 = vector.load %arg11[%c32, %c0_29] : memref<36x512xf32, #tpu.memory_space<vmem>>, vector<4x512xf32>
    tpu.vector_store %arg11[%c32, %c0_29], %43 {strides = array<i32>} : memref<36x512xf32, #tpu.memory_space<vmem>>, vector<4x512xf32>,
    %c0_30 = arith.constant 0 : index
    %c0_31 = arith.constant 0 : index
    %c0_32 = arith.constant 0 : index
    %45 = vector.load %arg5[%c0_30, %c0_31, %c0_32] : memref<1x4x512xf32, #tpu.memory_space<vmem>>, vector<1x4x512xf32>
    %46 = vector.shape_cast %45 : vector<1x4x512xf32> to vector<4x512xf32>
    %c17_i32_33 = arith.constant 17 : i32
    %47 = tpu.dynamic_rotate %46 by %c17_i32_33 dim 1 : vector<4x512xf32>, i32 -> vector<4x512xf32>
    %c0_34 = arith.constant 0 : index
    %c0_35 = arith.constant 0 : index
    %c0_36 = arith.constant 0 : index
    %48 = vector.load %arg1[%c0_34, %c0_35, %c0_36] : memref<9x4x512xf32, #tpu.memory_space<vmem>>, vector<1x4x512xf32>
    %49 = vector.shape_cast %48 : vector<1x4x512xf32> to vector<4x512xf32>
    %50 = arith.mulf %47, %49 : vector<4x512xf32>
    %c0_37 = arith.constant 0 : index
    %c0_38 = arith.constant 0 : index
    %51 = vector.load %arg12[%c0_37, %c0_38] : memref<36x512xf32, #tpu.memory_space<vmem>>, vector<4x512xf32>
    tpu.vector_store %arg12[%c0_37, %c0_38], %50 {strides = array<i32>} : memref<36x512xf32, #tpu.memory_space<vmem>>, vector<4x512xf32>,
    %c16_i32_39 = arith.constant 16 : i32
    %52 = tpu.dynamic_rotate %46 by %c16_i32_39 dim 1 : vector<4x512xf32>, i32 -> vector<4x512xf32>
    %c1_40 = arith.constant 1 : index
    %c0_41 = arith.constant 0 : index
    %c0_42 = arith.constant 0 : index
    %53 = vector.load %arg1[%c1_40, %c0_41, %c0_42] : memref<9x4x512xf32, #tpu.memory_space<vmem>>, vector<1x4x512xf32>
    %54 = vector.shape_cast %53 : vector<1x4x512xf32> to vector<4x512xf32>
    %55 = arith.mulf %52, %54 : vector<4x512xf32>
    %c4_43 = arith.constant 4 : index
    %c0_44 = arith.constant 0 : index
    %56 = vector.load %arg12[%c4_43, %c0_44] : memref<36x512xf32, #tpu.memory_space<vmem>>, vector<4x512xf32>
    tpu.vector_store %arg12[%c4_43, %c0_44], %55 {strides = array<i32>} : memref<36x512xf32, #tpu.memory_space<vmem>>, vector<4x512xf32>,
    %c15_i32_45 = arith.constant 15 : i32
    %57 = tpu.dynamic_rotate %46 by %c15_i32_45 dim 1 : vector<4x512xf32>, i32 -> vector<4x512xf32>
    %c2_46 = arith.constant 2 : index
    %c0_47 = arith.constant 0 : index
    %c0_48 = arith.constant 0 : index
    %58 = vector.load %arg1[%c2_46, %c0_47, %c0_48] : memref<9x4x512xf32, #tpu.memory_space<vmem>>, vector<1x4x512xf32>
    %59 = vector.shape_cast %58 : vector<1x4x512xf32> to vector<4x512xf32>
    %60 = arith.mulf %57, %59 : vector<4x512xf32>
    %c8_49 = arith.constant 8 : index
    %c0_50 = arith.constant 0 : index
    %61 = vector.load %arg12[%c8_49, %c0_50] : memref<36x512xf32, #tpu.memory_space<vmem>>, vector<4x512xf32>
    tpu.vector_store %arg12[%c8_49, %c0_50], %60 {strides = array<i32>} : memref<36x512xf32, #tpu.memory_space<vmem>>, vector<4x512xf32>,
    %c1_i32_51 = arith.constant 1 : i32
    %62 = tpu.dynamic_rotate %46 by %c1_i32_51 dim 1 : vector<4x512xf32>, i32 -> vector<4x512xf32>
    %c3_52 = arith.constant 3 : index
    %c0_53 = arith.constant 0 : index
    %c0_54 = arith.constant 0 : index
    %63 = vector.load %arg1[%c3_52, %c0_53, %c0_54] : memref<9x4x512xf32, #tpu.memory_space<vmem>>, vector<1x4x512xf32>
    %64 = vector.shape_cast %63 : vector<1x4x512xf32> to vector<4x512xf32>
    %65 = arith.mulf %62, %64 : vector<4x512xf32>
    %c12_55 = arith.constant 12 : index
    %c0_56 = arith.constant 0 : index
    %66 = vector.load %arg12[%c12_55, %c0_56] : memref<36x512xf32, #tpu.memory_space<vmem>>, vector<4x512xf32>
    tpu.vector_store %arg12[%c12_55, %c0_56], %65 {strides = array<i32>} : memref<36x512xf32, #tpu.memory_space<vmem>>, vector<4x512xf32>,
    %c16_57 = arith.constant 16 : index
    %c0_58 = arith.constant 0 : index
    %67 = vector.load %arg12[%c16_57, %c0_58] : memref<36x512xf32, #tpu.memory_space<vmem>>, vector<4x512xf32>
    tpu.vector_store %arg12[%c16_57, %c0_58], %46 {strides = array<i32>} : memref<36x512xf32, #tpu.memory_space<vmem>>, vector<4x512xf32>,
    %c511_i32_59 = arith.constant 511 : i32
    %68 = tpu.dynamic_rotate %46 by %c511_i32_59 dim 1 : vector<4x512xf32>, i32 -> vector<4x512xf32>
    %c5_60 = arith.constant 5 : index
    %c0_61 = arith.constant 0 : index
    %c0_62 = arith.constant 0 : index
    %69 = vector.load %arg1[%c5_60, %c0_61, %c0_62] : memref<9x4x512xf32, #tpu.memory_space<vmem>>, vector<1x4x512xf32>
    %70 = vector.shape_cast %69 : vector<1x4x512xf32> to vector<4x512xf32>
    %71 = arith.mulf %68, %70 : vector<4x512xf32>
    %c20_63 = arith.constant 20 : index
    %c0_64 = arith.constant 0 : index
    %72 = vector.load %arg12[%c20_63, %c0_64] : memref<36x512xf32, #tpu.memory_space<vmem>>, vector<4x512xf32>
    tpu.vector_store %arg12[%c20_63, %c0_64], %71 {strides = array<i32>} : memref<36x512xf32, #tpu.memory_space<vmem>>, vector<4x512xf32>,
    %c497_i32_65 = arith.constant 497 : i32
    %73 = tpu.dynamic_rotate %46 by %c497_i32_65 dim 1 : vector<4x512xf32>, i32 -> vector<4x512xf32>
    %c6_66 = arith.constant 6 : index
    %c0_67 = arith.constant 0 : index
    %c0_68 = arith.constant 0 : index
    %74 = vector.load %arg1[%c6_66, %c0_67, %c0_68] : memref<9x4x512xf32, #tpu.memory_space<vmem>>, vector<1x4x512xf32>
    %75 = vector.shape_cast %74 : vector<1x4x512xf32> to vector<4x512xf32>
    %76 = arith.mulf %73, %75 : vector<4x512xf32>
    %c24_69 = arith.constant 24 : index
    %c0_70 = arith.constant 0 : index
    %77 = vector.load %arg12[%c24_69, %c0_70] : memref<36x512xf32, #tpu.memory_space<vmem>>, vector<4x512xf32>
    tpu.vector_store %arg12[%c24_69, %c0_70], %76 {strides = array<i32>} : memref<36x512xf32, #tpu.memory_space<vmem>>, vector<4x512xf32>,
    %c496_i32_71 = arith.constant 496 : i32
    %78 = tpu.dynamic_rotate %46 by %c496_i32_71 dim 1 : vector<4x512xf32>, i32 -> vector<4x512xf32>
    %c7_72 = arith.constant 7 : index
    %c0_73 = arith.constant 0 : index
    %c0_74 = arith.constant 0 : index
    %79 = vector.load %arg1[%c7_72, %c0_73, %c0_74] : memref<9x4x512xf32, #tpu.memory_space<vmem>>, vector<1x4x512xf32>
    %80 = vector.shape_cast %79 : vector<1x4x512xf32> to vector<4x512xf32>
    %81 = arith.mulf %78, %80 : vector<4x512xf32>
    %c28_75 = arith.constant 28 : index
    %c0_76 = arith.constant 0 : index
    %82 = vector.load %arg12[%c28_75, %c0_76] : memref<36x512xf32, #tpu.memory_space<vmem>>, vector<4x512xf32>
    tpu.vector_store %arg12[%c28_75, %c0_76], %81 {strides = array<i32>} : memref<36x512xf32, #tpu.memory_space<vmem>>, vector<4x512xf32>,
    %c495_i32_77 = arith.constant 495 : i32
    %83 = tpu.dynamic_rotate %46 by %c495_i32_77 dim 1 : vector<4x512xf32>, i32 -> vector<4x512xf32>
    %c8_78 = arith.constant 8 : index
    %c0_79 = arith.constant 0 : index
    %c0_80 = arith.constant 0 : index
    %84 = vector.load %arg1[%c8_78, %c0_79, %c0_80] : memref<9x4x512xf32, #tpu.memory_space<vmem>>, vector<1x4x512xf32>
    %85 = vector.shape_cast %84 : vector<1x4x512xf32> to vector<4x512xf32>
    %86 = arith.mulf %83, %85 : vector<4x512xf32>
    %c32_81 = arith.constant 32 : index
    %c0_82 = arith.constant 0 : index
    %87 = vector.load %arg12[%c32_81, %c0_82] : memref<36x512xf32, #tpu.memory_space<vmem>>, vector<4x512xf32>
    tpu.vector_store %arg12[%c32_81, %c0_82], %86 {strides = array<i32>} : memref<36x512xf32, #tpu.memory_space<vmem>>, vector<4x512xf32>,
    %c0_83 = arith.constant 0 : index
    %c0_84 = arith.constant 0 : index
    %c0_85 = arith.constant 0 : index
    %88 = vector.load %arg2[%c0_83, %c0_84, %c0_85] : memref<1x8x36xf32, #tpu.memory_space<vmem>>, vector<1x8x36xf32>
    %89 = vector.shape_cast %88 : vector<1x8x36xf32> to vector<8x36xf32>
    %c0_86 = arith.constant 0 : index
    %c0_87 = arith.constant 0 : index
    %90 = vector.load %arg11[%c0_86, %c0_87] : memref<36x512xf32, #tpu.memory_space<vmem>>, vector<36x512xf32>
    %cst = arith.constant dense<0.000000e+00> : vector<8x512xf32>
    %91 = tpu.matmul %89, %90, %cst {dimension_numbers = #tpu.dot_dimension_numbers<[1], [0], [0], [1], [0, 0, 1, 1], [], []>} : vector<8x36xf32>, vector<36x512xf32>, vector<8x512xf32> -> vector<8x512xf32>
    %c0_88 = arith.constant 0 : index
    %c0_89 = arith.constant 0 : index
    %c0_90 = arith.constant 0 : index
    %92 = vector.load %arg3[%c0_88, %c0_89, %c0_90] : memref<1x8x36xf32, #tpu.memory_space<vmem>>, vector<1x8x36xf32>
    %93 = vector.shape_cast %92 : vector<1x8x36xf32> to vector<8x36xf32>
    %c0_91 = arith.constant 0 : index
    %c0_92 = arith.constant 0 : index
    %94 = vector.load %arg12[%c0_91, %c0_92] : memref<36x512xf32, #tpu.memory_space<vmem>>, vector<36x512xf32>
    %cst_93 = arith.constant dense<0.000000e+00> : vector<8x512xf32>
    %95 = tpu.matmul %93, %94, %cst_93 {dimension_numbers = #tpu.dot_dimension_numbers<[1], [0], [0], [1], [0, 0, 1, 1], [], []>} : vector<8x36xf32>, vector<36x512xf32>, vector<8x512xf32> -> vector<8x512xf32>
    %96 = arith.addf %91, %95 : vector<8x512xf32>
    %c0_94 = arith.constant 0 : index
    %c0_95 = arith.constant 0 : index
    %c0_96 = arith.constant 0 : index
    %97 = vector.load %arg4[%c0_94, %c0_95, %c0_96] : memref<1x8x512xf32, #tpu.memory_space<vmem>>, vector<1x8x512xf32>
    %98 = vector.shape_cast %97 : vector<1x8x512xf32> to vector<8x512xf32>
    %99 = arith.addf %96, %98 : vector<8x512xf32>
    %100 = vector.extract_strided_slice %99 {offsets = [0, 0], sizes = [4, 512], strides = [1, 1]} : vector<8x512xf32> to vector<4x512xf32>
    %cst_97 = arith.constant 0.000000e+00 : f32
    %101 = vector.broadcast %cst_97 : f32 to vector<4x512xf32>
    %102 = arith.maximumf %100, %101 : vector<4x512xf32>
    %103 = vector.extract_strided_slice %99 {offsets = [4, 0], sizes = [4, 512], strides = [1, 1]} : vector<8x512xf32> to vector<4x512xf32>
    %cst_98 = arith.constant 5.000000e-01 : f32
    %104 = vector.broadcast %cst_98 : f32 to vector<4x512xf32>
    %105 = arith.mulf %104, %103 : vector<4x512xf32>
    %106 = math.tanh %105 : vector<4x512xf32>
    %cst_99 = arith.constant 1.000000e+00 : f32
    %107 = vector.broadcast %cst_99 : f32 to vector<4x512xf32>
    %108 = arith.addf %106, %107 : vector<4x512xf32>
    %cst_100 = arith.constant 5.000000e-01 : f32
    %109 = vector.broadcast %cst_100 : f32 to vector<4x512xf32>
    %110 = arith.mulf %109, %108 : vector<4x512xf32>
    %c0_101 = arith.constant 0 : index
    %c0_102 = arith.constant 0 : index
    %111 = vector.load %arg10[%c0_101, %c0_102] : memref<4x512xf32, #tpu.memory_space<vmem>>, vector<4x512xf32>
    %112 = arith.addf %111, %102 : vector<4x512xf32>
    %c0_103 = arith.constant 0 : index
    %c0_104 = arith.constant 0 : index
    %c0_105 = arith.constant 0 : index
    %113 = vector.load %arg6[%c0_103, %c0_104, %c0_105] : memref<1x4x512xf32, #tpu.memory_space<vmem>>, vector<1x4x512xf32>
    %114 = vector.shape_cast %113 : vector<1x4x512xf32> to vector<4x512xf32>
    %115 = vector.shape_cast %112 : vector<4x512xf32> to vector<1x4x512xf32>
    tpu.vector_store %arg6[%c0_103, %c0_104, %c0_105], %115 {strides = array<i32>} : memref<1x4x512xf32, #tpu.memory_space<vmem>>, vector<1x4x512xf32>,
    %c0_106 = arith.constant 0 : index
    %c0_107 = arith.constant 0 : index
    %c0_108 = arith.constant 0 : index
    %116 = vector.load %arg7[%c0_106, %c0_107, %c0_108] : memref<1x4x512xf32, #tpu.memory_space<vmem>>, vector<1x4x512xf32>
    %117 = vector.shape_cast %116 : vector<1x4x512xf32> to vector<4x512xf32>
    %118 = vector.shape_cast %102 : vector<4x512xf32> to vector<1x4x512xf32>
    tpu.vector_store %arg7[%c0_106, %c0_107, %c0_108], %118 {strides = array<i32>} : memref<1x4x512xf32, #tpu.memory_space<vmem>>, vector<1x4x512xf32>,
    %119 = arith.mulf %102, %110 : vector<4x512xf32>
    %c0_109 = arith.constant 0 : index
    %c0_110 = arith.constant 0 : index
    %c0_111 = arith.constant 0 : index
    %120 = vector.load %arg8[%c0_109, %c0_110, %c0_111] : memref<1x4x512xf32, #tpu.memory_space<vmem>>, vector<1x4x512xf32>
    %121 = vector.shape_cast %120 : vector<1x4x512xf32> to vector<4x512xf32>
    %122 = vector.shape_cast %119 : vector<4x512xf32> to vector<1x4x512xf32>
    tpu.vector_store %arg8[%c0_109, %c0_110, %c0_111], %122 {strides = array<i32>} : memref<1x4x512xf32, #tpu.memory_space<vmem>>, vector<1x4x512xf32>,
    %c0_112 = arith.constant 0 : index
    %c0_113 = arith.constant 0 : index
    %123 = vector.load %arg10[%c0_112, %c0_113] : memref<4x512xf32, #tpu.memory_space<vmem>>, vector<4x512xf32>
    tpu.vector_store %arg10[%c0_112, %c0_113], %112 {strides = array<i32>} : memref<4x512xf32, #tpu.memory_space<vmem>>, vector<4x512xf32>,
    %c0_114 = arith.constant 0 : index
    %c0_115 = arith.constant 0 : index
    %124 = vector.load %arg9[%c0_114, %c0_115] : memref<4x512xf32, #tpu.memory_space<vmem>>, vector<4x512xf32>
    tpu.vector_store %arg9[%c0_114, %c0_115], %102 {strides = array<i32>} : memref<4x512xf32, #tpu.memory_space<vmem>>, vector<4x512xf32>,
    %c0_i32_116 = arith.constant 0 : i32
    %125 = arith.cmpi eq, %arg0, %c0_i32_116 : i32
    %126 = arith.extui %125 : i1 to i32
    %c0_i32_117 = arith.constant 0 : i32
    %127 = arith.cmpi ne, %126, %c0_i32_117 : i32
    scf.if %127 {
      %c0_118 = arith.constant 0 : index
      %c0_119 = arith.constant 0 : index
      %c0_120 = arith.constant 0 : index
      %128 = vector.load %arg8[%c0_118, %c0_119, %c0_120] : memref<1x4x512xf32, #tpu.memory_space<vmem>>, vector<1x4x512xf32>
      %129 = vector.shape_cast %128 : vector<1x4x512xf32> to vector<4x512xf32>
      %130 = vector.shape_cast %102 : vector<4x512xf32> to vector<1x4x512xf32>
      tpu.vector_store %arg8[%c0_118, %c0_119, %c0_120], %130 {strides = array<i32>} : memref<1x4x512xf32, #tpu.memory_space<vmem>>, vector<1x4x512xf32>,
    } else {
    }
    return
  }
  func.func @transform_0(%arg0: i32) -> (i32, i32, i32) {
    %c0_i32 = arith.constant 0 : i32
    %c0_i32_0 = arith.constant 0 : i32
    %c0_i32_1 = arith.constant 0 : i32
    %c0_i32_2 = arith.constant 0 : i32
    return %c0_i32, %c0_i32_0, %c0_i32_1 : i32, i32, i32
  }
  func.func @transform_1(%arg0: i32) -> (i32, i32, i32) {
    %c0_i32 = arith.constant 0 : i32
    %c0_i32_0 = arith.constant 0 : i32
    %c0_i32_1 = arith.constant 0 : i32
    return %arg0, %c0_i32, %c0_i32_0 : i32, i32, i32
  }
  func.func @transform_2(%arg0: i32) -> (i32, i32, i32) {
    %c0_i32 = arith.constant 0 : i32
    %c0_i32_0 = arith.constant 0 : i32
    %c0_i32_1 = arith.constant 0 : i32
    return %arg0, %c0_i32, %c0_i32_0 : i32, i32, i32
  }
  func.func @transform_3(%arg0: i32) -> (i32, i32, i32) {
    %c0_i32 = arith.constant 0 : i32
    %c0_i32_0 = arith.constant 0 : i32
    %c0_i32_1 = arith.constant 0 : i32
    return %arg0, %c0_i32, %c0_i32_0 : i32, i32, i32
  }
  func.func @transform_4(%arg0: i32) -> (i32, i32, i32) {
    %c0_i32 = arith.constant 0 : i32
    %c0_i32_0 = arith.constant 0 : i32
    %c0_i32_1 = arith.constant 0 : i32
    return %arg0, %c0_i32, %c0_i32_0 : i32, i32, i32
  }
  func.func @transform_5(%arg0: i32) -> (i32, i32, i32) {
    %c0_i32 = arith.constant 0 : i32
    %c0_i32_0 = arith.constant 0 : i32
    %c0_i32_1 = arith.constant 0 : i32
    return %arg0, %c0_i32, %c0_i32_0 : i32, i32, i32
  }
  func.func @transform_6(%arg0: i32) -> (i32, i32, i32) {
    %c0_i32 = arith.constant 0 : i32
    %c0_i32_0 = arith.constant 0 : i32
    %c0_i32_1 = arith.constant 0 : i32
    return %arg0, %c0_i32, %c0_i32_0 : i32, i32, i32
  }
  func.func @transform_7(%arg0: i32) -> (i32, i32, i32) {
    %c0_i32 = arith.constant 0 : i32
    %c0_i32_0 = arith.constant 0 : i32
    %c0_i32_1 = arith.constant 0 : i32
    return %arg0, %c0_i32, %c0_i32_0 : i32, i32, i32
  }
}

</mosaic_0001>

<bundles_post_ra>
// kernel: run.1
= control target key start
LH: loop header
LB: loop body
LE: loop exit
PB: predicated region body
PF: predicated region fallthrough
CT: control target
= control target key end

     0   :  { %s1751_s24 = smov 0   ;;  %s2318_s0 = inlined_call_operand.vmem [shape: f32[9,4,512], index: 0, kind: input, shape index: {}]   ;;  %s2319_s1 = inlined_call_operand.vmem [shape: f32[4,8,36], index: 1, kind: input, shape index: {}]   ;;  %s2320_s2 = inlined_call_operand.vmem [shape: f32[4,8,36], index: 2, kind: input, shape index: {}]   ;;  %s2321_s3 = inlined_call_operand.vmem [shape: f32[4,8,512], index: 3, kind: input, shape index: {}]   ;;  %s2322_s4 = inlined_call_operand.vmem [shape: f32[4,4,512], index: 4, kind: input, shape index: {}]   ;;  %s2323_s5 = inlined_call_operand.vmem [shape: f32[4,4,512], index: 5, kind: output, shape index: {0}]   ;;  %s2324_s6 = inlined_call_operand.vmem [shape: f32[4,4,512], index: 6, kind: output, shape index: {1}]   ;;  %s2325_s7 = inlined_call_operand.vmem [shape: f32[4,4,512], index: 7, kind: output, shape index: {2}]  }
   0x1 LB: > { %s1757_s25 = sadd.s32 4294967295, %s1699_s24   ;;  %p1549_p0 = scmp.ge.s32.totalorder %s1699_s24, 1  ;;  %s1699_s24 = sphi %s1751_s24, %s18_s24  }
   0x2   : > { %p270_p1 = scmp.lt.s32.totalorder %s1699_s24, 5 }
   0x4   : > { %p271_p2 = pnand %p1549_p0, %p270_p1 }
   0x5   : > { %p325_p3 = scmp.lt.s32.totalorder (!%p271_p2), %s1757_s25, 3  ;;  %p1562_p4 = scmp.ne.s32.totalorder (!%p271_p2), %s1757_s25, 0 }
   0x6   : > { %274 = sbr.rel (%p271_p2) target bundleno = 516 (0x204), region = 40 }
   0xd   : > { %s326_s26 = scalar_select %p325_p3, %s1757_s25, 3 }
   0xe   : > { %361 = sbr.rel (%p1562_p4) target bundleno = 21 (0x15), region = 44  ;;  %v1701_v0 = vmov (!%p1562_p4), 0.0  }
   0xf   : > { %s1550_s27 = sshll.u32 %s326_s26, 3  ;;  %s1606_s28 = sshll.u32 %s326_s26, 5  ;;  %362 = vst [vmem:[#allocation2] sm:$0xff] (!%p1562_p4), %v1701_v0  ;;  %363 = vst [vmem:[#allocation2 + $0x8] sm:$0xff] (!%p1562_p4), %v1701_v0 }
  0x10   : > { %s1766_s8 = scalar_lea.vmem %s2319_s1, %s1550_s27  ;;  %s1771_s11 = scalar_lea.vmem %s2320_s2, %s1550_s27  ;;  %364 = vst [vmem:[#allocation3] sm:$0xff] (!%p1562_p4), %v1701_v0  ;;  %365 = vst [vmem:[#allocation3 + $0x8] sm:$0xff] (!%p1562_p4), %v1701_v0 }
  0x11   : > { %s1776_s14 = scalar_lea.vmem %s2321_s3, %s1606_s28  ;;  %s1607_s15 = sshll.u32 %s326_s26, 4 }
  0x12   : > { %s342_s18 = scalar_lea.vmem %s2322_s4, %s1607_s15  ;;  %s1784_s21 = scalar_lea.vmem %s2323_s5, %s1607_s15 }
  0x13   : > { %s1789_s27 = scalar_lea.vmem %s2324_s6, %s1607_s15  ;;  %s1794_s28 = scalar_lea.vmem %s2325_s7, %s1607_s15 }
  0x15 PF: > { %v1799_v1 = vld [vmem:[%s342_s18 + $0x8] sm:$0xff]  ;;  %v1801_v2 = vld [vmem:[%s342_s18] sm:$0xff]  ;;  %s1702_s26 = smov 16   ;;  %s1703_s9 = smov 1   ;;  %v1710_v9 = vmov 0.0   ;;  %v382_v10 = vlaneseq  ;;  %v1932_v12 = vld [vmem:[%s2318_s0 + $0x10] sm:$0xff] }
  0x16   : > { %v1803_v3 = vld [vmem:[#allocation2] sm:$0xff]  ;;  %707 = vrot.lane.b32.xlu1 %v1799_v1, %s1702_s26  ;;  %813 = vst [vmem:[#allocation5 + $0x50] sm:$0xf] %v1799_v1  ;;  %703 = vrot.lane.b32.xlu0 %v1801_v2, %s1702_s26  ;;  %811 = vst [vmem:[#allocation5 + $0x40] sm:$0xf] %v1801_v2  ;;  %v672_v4 = vcombine.high %v1799_v1, %v1799_v1  ;;  %v671_v5 = vcombine.high %v1801_v2, %v1801_v2  ;;  %v1820_v7 = vld [vmem:[#allocation2 + $0x8] sm:$0xff] }
  0x17   : > { %519 = vst [vmem:[#allocation4 + $0x40] sm:$0xf] %v1803_v3  ;;  %v1818_v6 = vcombine.high %v1803_v3, %v1803_v3  ;;  %521 = vst [vmem:[#allocation4 + $0x50] sm:$0xf] %v1820_v7  ;;  %v1825_v8 = vcombine.high %v1820_v7, %v1820_v7  ;;  %s1704_s10 = smov 17   ;;  %s1705_s12 = smov 15   ;;  %1074 = vmatprep.mubr.f32.mxu0 %v1710_v9  ;;  %1145 = vmatprep.mubr.f32.mxu1 %v1710_v9 }
  0x18   : > { %814 = vst [vmem:[#allocation5 + $0x58] sm:$0xf] %v672_v4  ;;  %812 = vst [vmem:[#allocation5 + $0x48] sm:$0xf] %v671_v5  ;;  %s1706_s13 = smov 127   ;;  %s1707_s15 = smov 112   ;;  %v1955_v18 = vcombine.high %v1932_v12, %v1932_v12 }
  0x19   : > { %520 = vst [vmem:[#allocation4 + $0x48] sm:$0xf] %v1818_v6  ;;  %522 = vst [vmem:[#allocation4 + $0x58] sm:$0xf] %v1825_v8  ;;  %s1708_s16 = smov 113   ;;  %s1709_s17 = smov 111  }
  0x1a   : > { %709 = vrot.lane.b32.xlu1 %v672_v4, %s1702_s26  ;;  %705 = vrot.lane.b32.xlu0 %v671_v5, %s1702_s26  ;;  %v1927_v11 = vand.u32 127, %v382_v10  ;;  %v1937_v13 = vld [vmem:[%s2318_s0 + $0x18] sm:$0xff]  ;;  %v1942_v16 = vld [vmem:[%s2318_s0 + $0x30] sm:$0xff]  ;;  %vm997_vm8 = vcmask 1043456   ;;  %vm993_vm9 = vcmask 293888  }
  0x1b   : > { %v1950_v17 = vcombine.high %v1937_v13, %v1937_v13  ;;  %v1959_v21 = vcombine.high %v1942_v16, %v1942_v16  ;;  %v1981_v30 = vld [vmem:[%s2318_s0 + $0x38] sm:$0xff]  ;;  %v1997_v40 = vld [vmem:[%s2318_s0] sm:$0xff]  ;;  %v2016_v51 = vld [vmem:[%s2318_s0 + $0x8] sm:$0xff] }
  0x1c   : > { %vm413_vm0 = vcmp.lt.s32.totalorder %v1927_v11, 16  ;;  %vm485_vm1 = vcmp.lt.s32.totalorder %v1927_v11, 1  ;;  %v1990_v39 = vcombine.high %v1981_v30, %v1981_v30  ;;  %vm384_vm2 = vcmp.lt.s32.totalorder %v1927_v11, 17  ;;  %v2028_v60 = vld [vmem:[%s2318_s0 + $0x20] sm:$0xff] }
  0x1d   : > { %v2011_v50 = vcombine.high %v1997_v40, %v1997_v40  ;;  %v2023_v59 = vcombine.high %v2016_v51, %v2016_v51  ;;  %vm455_vm3 = vcmp.lt.s32.totalorder %v1927_v11, 15  ;;  %vm531_vm4 = vcmp.lt.s32.totalorder %v1927_v11, 127 }
  0x1e   : > { %773 = vrot.lane.b32.xlu1 %v671_v5, %s1703_s9  ;;  %771 = vrot.lane.b32.xlu0 %v1801_v2, %s1703_s9  ;;  %vm603_vm5 = vcmp.lt.s32.totalorder %v1927_v11, 112  ;;  %vm573_vm6 = vcmp.lt.s32.totalorder %v1927_v11, 113  ;;  %vm645_vm7 = vcmp.lt.s32.totalorder %v1927_v11, 111 }
  0x22   : > { %777 = vrot.lane.b32.xlu1 %v672_v4, %s1703_s9  ;;  %775 = vrot.lane.b32.xlu0 %v1799_v1, %s1703_s9 }
  0x26   : > { %677 = vrot.lane.b32.xlu1 %v671_v5, %s1704_s10  ;;  %675 = vrot.lane.b32.xlu0 %v1801_v2, %s1704_s10 }
  0x2a   : > { %681 = vrot.lane.b32.xlu1 %v672_v4, %s1704_s10  ;;  %679 = vrot.lane.b32.xlu0 %v1799_v1, %s1704_s10 }
  0x2e   : > { %745 = vrot.lane.b32.xlu1 %v671_v5, %s1705_s12  ;;  %743 = vrot.lane.b32.xlu0 %v1801_v2, %s1705_s12 }
  0x32   : > { %749 = vrot.lane.b32.xlu1 %v672_v4, %s1705_s12  ;;  %747 = vrot.lane.b32.xlu0 %v1799_v1, %s1705_s12 }
  0x36   : > { %817 = vrot.lane.b32.xlu1 %v671_v5, %s1706_s13  ;;  %815 = vrot.lane.b32.xlu0 %v1801_v2, %s1706_s13 }
  0x3a   : > { %821 = vrot.lane.b32.xlu1 %v672_v4, %s1706_s13  ;;  %819 = vrot.lane.b32.xlu0 %v1799_v1, %s1706_s13 }
  0x3e   : > { %885 = vrot.lane.b32.xlu1 %v671_v5, %s1707_s15  ;;  %883 = vrot.lane.b32.xlu0 %v1801_v2, %s1707_s15 }
  0x42   : > { %889 = vrot.lane.b32.xlu1 %v672_v4, %s1707_s15  ;;  %887 = vrot.lane.b32.xlu0 %v1799_v1, %s1707_s15 }
  0x46   : > { %857 = vrot.lane.b32.xlu1 %v671_v5, %s1708_s16  ;;  %855 = vrot.lane.b32.xlu0 %v1801_v2, %s1708_s16 }
  0x4a   : > { %861 = vrot.lane.b32.xlu1 %v672_v4, %s1708_s16  ;;  %859 = vrot.lane.b32.xlu0 %v1799_v1, %s1708_s16 }
  0x4e   : > { %405 = vrot.lane.b32.xlu0 %v1803_v3, %s1702_s26  ;;  %407 = vrot.lane.b32.xlu1 %v1818_v6, %s1702_s26 }
  0x52   : > { %409 = vrot.lane.b32.xlu0 %v1820_v7, %s1702_s26  ;;  %411 = vrot.lane.b32.xlu1 %v1825_v8, %s1702_s26 }
  0x56   : > { %477 = vrot.lane.b32.xlu0 %v1803_v3, %s1703_s9  ;;  %479 = vrot.lane.b32.xlu1 %v1818_v6, %s1703_s9 }
  0x5a   : > { %481 = vrot.lane.b32.xlu0 %v1820_v7, %s1703_s9  ;;  %483 = vrot.lane.b32.xlu1 %v1825_v8, %s1703_s9 }
  0x5e   : > { %374 = vrot.lane.b32.xlu0 %v1803_v3, %s1704_s10  ;;  %376 = vrot.lane.b32.xlu1 %v1818_v6, %s1704_s10 }
  0x62   : > { %378 = vrot.lane.b32.xlu0 %v1820_v7, %s1704_s10  ;;  %380 = vrot.lane.b32.xlu1 %v1825_v8, %s1704_s10 }
  0x66   : > { %447 = vrot.lane.b32.xlu0 %v1803_v3, %s1705_s12  ;;  %449 = vrot.lane.b32.xlu1 %v1818_v6, %s1705_s12 }
  0x6a   : > { %451 = vrot.lane.b32.xlu0 %v1820_v7, %s1705_s12  ;;  %453 = vrot.lane.b32.xlu1 %v1825_v8, %s1705_s12 }
  0x6e   : > { %923 = vrot.lane.b32.xlu0 %v1801_v2, %s1709_s17  ;;  %925 = vrot.lane.b32.xlu1 %v671_v5, %s1709_s17  ;;  %v2042_v5 = vcombine.high %v2028_v60, %v2028_v60 }
  0x72   : > { %927 = vrot.lane.b32.xlu0 %v1799_v1, %s1709_s17  ;;  %929 = vrot.lane.b32.xlu1 %v672_v4, %s1709_s17 }
  0x76   : > { %523 = vrot.lane.b32.xlu0 %v1803_v3, %s1706_s13  ;;  %525 = vrot.lane.b32.xlu1 %v1818_v6, %s1706_s13 }
  0x7a   : > { %527 = vrot.lane.b32.xlu0 %v1820_v7, %s1706_s13  ;;  %529 = vrot.lane.b32.xlu1 %v1825_v8, %s1706_s13 }
  0x7e   : > { %595 = vrot.lane.b32.xlu0 %v1803_v3, %s1707_s15  ;;  %597 = vrot.lane.b32.xlu1 %v1818_v6, %s1707_s15 }
  0x82   : > { %599 = vrot.lane.b32.xlu0 %v1820_v7, %s1707_s15  ;;  %601 = vrot.lane.b32.xlu1 %v1825_v8, %s1707_s15 }
  0x86   : > { %565 = vrot.lane.b32.xlu0 %v1803_v3, %s1708_s16  ;;  %567 = vrot.lane.b32.xlu1 %v1818_v6, %s1708_s16 }
  0x88   : > { %v708_v14 = vpop.permute.xlu1 %707  ;;  %v704_v15 = vpop.permute.xlu0 %703 }
  0x8a   : > { %569 = vrot.lane.b32.xlu0 %v1820_v7, %s1708_s16  ;;  %571 = vrot.lane.b32.xlu1 %v1825_v8, %s1708_s16 }
  0x8c   : > { %v710_v19 = vpop.permute.xlu1 %709  ;;  %v706_v20 = vpop.permute.xlu0 %705 }
  0x8d   : > { %v711_v22 = vsel %vm413_vm0, %v708_v14, %v710_v19  ;;  %v714_v23 = vsel %vm413_vm0, %v710_v19, %v704_v15  ;;  %v712_v24 = vsel %vm413_vm0, %v706_v20, %v708_v14  ;;  %v713_v25 = vsel %vm413_vm0, %v704_v15, %v706_v20 }
  0x8e   : > { %v723_v26 = vmul.f32 %v1932_v12, %v714_v23  ;;  %v726_v27 = vmul.f32 %v1950_v17, %v711_v22  ;;  %v724_v28 = vmul.f32 %v1955_v18, %v713_v25  ;;  %v725_v29 = vmul.f32 %v1937_v13, %v712_v24  ;;  %637 = vrot.lane.b32.xlu0 %v1803_v3, %s1709_s17 }
  0x8f   : > { %639 = vrot.lane.b32.xlu1 %v1818_v6, %s1709_s17  ;;  %v2047_v6 = vld [vmem:[%s2318_s0 + $0x28] sm:$0xff] }
  0x90   : > { %v731_v31 = vrot.slane %v723_v26, 4  ;;  %v734_v32 = vrot.slane %v726_v27, 4  ;;  %v732_v33 = vrot.slane %v724_v28, 4  ;;  %v733_v34 = vrot.slane %v725_v29, 4  ;;  %v774_v35 = vpop.permute.xlu1 %773  ;;  %v772_v36 = vpop.permute.xlu0 %771  ;;  %v2069_v28 = vld [vmem:[%s2318_s0 + $0x50] sm:$0xff]  ;;  %v2074_v29 = vld [vmem:[%s2318_s0 + $0x58] sm:$0xff] }
  0x91   : > { %v781_v37 = vsel %vm485_vm1, %v772_v36, %v774_v35  ;;  %v2054_v15 = vcombine.high %v2047_v6, %v2047_v6 }
  0x92   : > { %739 = vst [vmem:[#allocation5] sm:$0xf0] %v731_v31  ;;  %742 = vst [vmem:[#allocation5 + $0x18] sm:$0xf0] %v734_v32  ;;  %v792_v38 = vmul.f32 %v1959_v21, %v781_v37  ;;  %641 = vrot.lane.b32.xlu0 %v1820_v7, %s1709_s17 }
  0x93   : > { %740 = vst [vmem:[#allocation5 + $0x8] sm:$0xf0] %v732_v33  ;;  %741 = vst [vmem:[#allocation5 + $0x10] sm:$0xf0] %v733_v34  ;;  %643 = vrot.lane.b32.xlu1 %v1825_v8, %s1709_s17 }
  0x94   : > { %v800_v41 = vrot.slane %v792_v38, 4  ;;  %v778_v42 = vpop.permute.xlu1 %777  ;;  %v776_v43 = vpop.permute.xlu0 %775 }
  0x95   : > { %v782_v44 = vsel %vm485_vm1, %v778_v42, %v772_v36  ;;  %v779_v45 = vsel %vm485_vm1, %v776_v43, %v778_v42  ;;  %v780_v46 = vsel %vm485_vm1, %v774_v35, %v776_v43  ;;  %v2081_v35 = vcombine.high %v2074_v29, %v2074_v29 }
  0x96   : > { %808 = vst [vmem:[#allocation5 + $0x28] sm:$0xf0] %v800_v41  ;;  %v791_v47 = vmul.f32 %v1942_v16, %v782_v44  ;;  %v793_v48 = vmul.f32 %v1981_v30, %v780_v46  ;;  %v794_v49 = vmul.f32 %v1990_v39, %v779_v45  ;;  %v2085_v36 = vcombine.high %v2069_v28, %v2069_v28 }
  0x98   : > { %v799_v52 = vrot.slane %v791_v47, 4  ;;  %v801_v53 = vrot.slane %v793_v48, 4  ;;  %v802_v54 = vrot.slane %v794_v49, 4  ;;  %v678_v55 = vpop.permute.xlu1 %677  ;;  %v676_v56 = vpop.permute.xlu0 %675 }
  0x99   : > { %v685_v57 = vsel %vm384_vm2, %v676_v56, %v678_v55 }
  0x9a   : > { %807 = vst [vmem:[#allocation5 + $0x20] sm:$0xf0] %v799_v52  ;;  %809 = vst [vmem:[#allocation5 + $0x30] sm:$0xf0] %v801_v53  ;;  %v696_v58 = vmul.f32 %v2011_v50, %v685_v57  ;;  %v2100_v53 = vld [vmem:[%s2318_s0 + $0x70] sm:$0xff] }
  0x9b   : > { %810 = vst [vmem:[#allocation5 + $0x38] sm:$0xf0] %v802_v54 }
  0x9c   : > { %700 = vst [vmem:[#allocation5 + $0x8] sm:$0xf] %v696_v58  ;;  %v682_v61 = vpop.permute.xlu1 %681  ;;  %v680_v62 = vpop.permute.xlu0 %679 }
  0x9d   : > { %v686_v63 = vsel %vm384_vm2, %v682_v61, %v676_v56  ;;  %v683_v0 = vsel %vm384_vm2, %v680_v62, %v682_v61  ;;  %v684_v1 = vsel %vm384_vm2, %v678_v55, %v680_v62  ;;  %v2105_v55 = vld [vmem:[%s2318_s0 + $0x78] sm:$0xff] }
  0x9e   : > { %v695_v2 = vmul.f32 %v1997_v40, %v686_v63  ;;  %v697_v3 = vmul.f32 %v2016_v51, %v684_v1  ;;  %v698_v4 = vmul.f32 %v2023_v59, %v683_v0 }
  0xa0   : > { %699 = vst [vmem:[#allocation5] sm:$0xf] %v695_v2  ;;  %701 = vst [vmem:[#allocation5 + $0x10] sm:$0xf] %v697_v3  ;;  %v746_v7 = vpop.permute.xlu1 %745  ;;  %v744_v8 = vpop.permute.xlu0 %743 }
  0xa1   : > { %702 = vst [vmem:[#allocation5 + $0x18] sm:$0xf] %v698_v4  ;;  %v753_v10 = vsel %vm455_vm3, %v744_v8, %v746_v7 }
  0xa2   : > { %v764_v14 = vmul.f32 %v2042_v5, %v753_v10 }
  0xa3   : > { %v974_v37 = vld [vmem:[#allocation5 + $0x8] sm:$0xff] }
  0xa4   : > { %768 = vst [vmem:[#allocation5 + $0x28] sm:$0xf] %v764_v14  ;;  %v750_v19 = vpop.permute.xlu1 %749  ;;  %v748_v20 = vpop.permute.xlu0 %747 }
  0xa5   : > { %v754_v22 = vsel %vm455_vm3, %v750_v19, %v744_v8  ;;  %v751_v23 = vsel %vm455_vm3, %v748_v20, %v750_v19  ;;  %v752_v24 = vsel %vm455_vm3, %v746_v7, %v748_v20  ;;  %v2112_v19 = vcombine.high %v2105_v55, %v2105_v55 }
  0xa6   : > { %v763_v25 = vmul.f32 %v2028_v60, %v754_v22  ;;  %v765_v26 = vmul.f32 %v2047_v6, %v752_v24  ;;  %v766_v27 = vmul.f32 %v2054_v15, %v751_v23  ;;  %v2116_v20 = vcombine.high %v2100_v53, %v2100_v53 }
  0xa7   : > { %v973_v54 = vld [vmem:[#allocation5] sm:$0xff]  ;;  %v975_v4 = vld [vmem:[#allocation5 + $0x10] sm:$0xff] }
  0xa8   : > { %767 = vst [vmem:[#allocation5 + $0x20] sm:$0xf] %v763_v25  ;;  %769 = vst [vmem:[#allocation5 + $0x30] sm:$0xf] %v765_v26  ;;  %v818_v31 = vpop.permute.xlu1 %817  ;;  %v816_v32 = vpop.permute.xlu0 %815  ;;  %v976_v3 = vld [vmem:[#allocation5 + $0x18] sm:$0xff] }
  0xa9   : > { %770 = vst [vmem:[#allocation5 + $0x38] sm:$0xf] %v766_v27  ;;  %v825_v33 = vsel %vm531_vm4, %v816_v32, %v818_v31 }
  0xaa   : > { %v835_v34 = vmul.f32 %v2069_v28, %v825_v33 }
  0xab   : > { %v978_v38 = vld [vmem:[#allocation5 + $0x28] sm:$0xff] }
  0xac   : > { %v843_v41 = vrot.slane %v835_v34, 4  ;;  %v822_v42 = vpop.permute.xlu1 %821  ;;  %v820_v43 = vpop.permute.xlu0 %819  ;;  %v1611_v44 = vpack.c.bf16 %v978_v38, %v974_v37  ;;  %v2131_v34 = vld [vmem:[%s2318_s0 + $0x60] sm:$0xff]  ;;  %v2136_v37 = vld [vmem:[%s2318_s0 + $0x68] sm:$0xff] }
  0xad   : > { %v826_v45 = vsel %vm531_vm4, %v822_v42, %v816_v32  ;;  %v823_v46 = vsel %vm531_vm4, %v820_v43, %v822_v42  ;;  %v824_v47 = vsel %vm531_vm4, %v818_v31, %v820_v43 }
  0xae   : > { %851 = vst [vmem:[#allocation5 + $0x40] sm:$0xf0] %v843_v41  ;;  %v838_v48 = vmul.f32 %v2081_v35, %v826_v45  ;;  %v836_v49 = vmul.f32 %v2085_v36, %v824_v47  ;;  %v837_v52 = vmul.f32 %v2074_v29, %v823_v46  ;;  %1612 = vmatprep.subr.bf16.mxu0 %v1611_v44 }
  0xaf   : > { %v977_v56 = vld [vmem:[#allocation5 + $0x20] sm:$0xff]  ;;  %v979_v58 = vld [vmem:[#allocation5 + $0x30] sm:$0xff]  ;;  %v2143_v47 = vcombine.high %v2136_v37, %v2136_v37 }
  0xb0   : > { %v980_v57 = vld [vmem:[#allocation5 + $0x38] sm:$0xff]  ;;  %v846_v61 = vrot.slane %v838_v48, 4  ;;  %v844_v62 = vrot.slane %v836_v49, 4  ;;  %v845_v63 = vrot.slane %v837_v52, 4  ;;  %v886_v0 = vpop.permute.xlu1 %885  ;;  %v884_v1 = vpop.permute.xlu0 %883  ;;  %v1613_v2 = vpack.c.bf16 %v977_v56, %v973_v54 }
  0xb1   : > { %v893_v7 = vsel %vm603_vm5, %v884_v1, %v886_v0  ;;  %v1619_v8 = vpack.c.bf16 %v980_v57, %v976_v3  ;;  %v1621_v10 = vpack.c.bf16 %v979_v58, %v975_v4  ;;  %v2147_v48 = vcombine.high %v2131_v34, %v2131_v34 }
  0xb2   : > { %854 = vst [vmem:[#allocation5 + $0x58] sm:$0xf0] %v846_v61  ;;  %852 = vst [vmem:[#allocation5 + $0x48] sm:$0xf0] %v844_v62  ;;  %v903_v14 = vmul.f32 %v2100_v53, %v893_v7  ;;  %1614 = vmatpush1.bf16.msra.mxu0 %v1613_v2 }
  0xb3   : > { %853 = vst [vmem:[#allocation5 + $0x50] sm:$0xf0] %v845_v63  ;;  %1620 = vmatprep.subr.bf16.mxu1 %v1619_v8 }
  0xb4   : > { %v911_v22 = vrot.slane %v903_v14, 4  ;;  %1622 = vmatpush1.bf16.msra.mxu1 %v1621_v10  ;;  %v890_v23 = vpop.permute.xlu1 %889  ;;  %v888_v24 = vpop.permute.xlu0 %887 }
  0xb5   : > { %v894_v25 = vsel %vm603_vm5, %v890_v23, %v884_v1  ;;  %v891_v26 = vsel %vm603_vm5, %v888_v24, %v890_v23  ;;  %v892_v27 = vsel %vm603_vm5, %v886_v0, %v888_v24 }
  0xb6   : > { %919 = vst [vmem:[#allocation5 + $0x60] sm:$0xf0] %v911_v22  ;;  %v906_v31 = vmul.f32 %v2112_v19, %v894_v25  ;;  %v904_v32 = vmul.f32 %v2116_v20, %v892_v27  ;;  %v905_v33 = vmul.f32 %v2105_v55, %v891_v26 }
  0xb8   : > { %v914_v38 = vrot.slane %v906_v31, 4  ;;  %v912_v41 = vrot.slane %v904_v32, 4  ;;  %v913_v42 = vrot.slane %v905_v33, 4  ;;  %v858_v43 = vpop.permute.xlu1 %857  ;;  %v856_v44 = vpop.permute.xlu0 %855 }
  0xb9   : > { %v865_v45 = vsel %vm573_vm6, %v856_v44, %v858_v43 }
  0xba   : > { %922 = vst [vmem:[#allocation5 + $0x78] sm:$0xf0] %v914_v38  ;;  %920 = vst [vmem:[#allocation5 + $0x68] sm:$0xf0] %v912_v41  ;;  %v875_v46 = vmul.f32 %v2131_v34, %v865_v45  ;;  %v981_v45 = vld [vmem:[#allocation5 + $0x40] sm:$0xff] }
  0xbb   : > { %921 = vst [vmem:[#allocation5 + $0x70] sm:$0xf0] %v913_v42 }
  0xbc   : > { %879 = vst [vmem:[#allocation5 + $0x60] sm:$0xf] %v875_v46  ;;  %v862_v49 = vpop.permute.xlu1 %861  ;;  %v860_v52 = vpop.permute.xlu0 %859  ;;  %v983_v46 = vld [vmem:[#allocation5 + $0x50] sm:$0xff] }
  0xbd   : > { %v866_v54 = vsel %vm573_vm6, %v862_v49, %v856_v44  ;;  %v863_v56 = vsel %vm573_vm6, %v860_v52, %v862_v49  ;;  %v864_v57 = vsel %vm573_vm6, %v858_v43, %v860_v52  ;;  %v984_v44 = vld [vmem:[#allocation5 + $0x58] sm:$0xff] }
  0xbe   : > { %v878_v58 = vmul.f32 %v2143_v47, %v866_v54  ;;  %v876_v61 = vmul.f32 %v2147_v48, %v864_v57  ;;  %v877_v62 = vmul.f32 %v2136_v37, %v863_v56 }
  0xc0   : > { %882 = vst [vmem:[#allocation5 + $0x78] sm:$0xf] %v878_v58  ;;  %880 = vst [vmem:[#allocation5 + $0x68] sm:$0xf] %v876_v61  ;;  %v406_v63 = vpop.permute.xlu0 %405  ;;  %v408_v0 = vpop.permute.xlu1 %407 }
  0xc1   : > { %881 = vst [vmem:[#allocation5 + $0x70] sm:$0xf] %v877_v62  ;;  %v416_v1 = vsel %vm413_vm0, %v406_v63, %v408_v0 }
  0xc2   : > { %v428_v2 = vmul.f32 %v1955_v18, %v416_v1  ;;  %v982_v18 = vld [vmem:[#allocation5 + $0x48] sm:$0xff] }
  0xc3   : > { %v985_v25 = vld [vmem:[#allocation5 + $0x60] sm:$0xff] }
  0xc4   : > { %v436_v3 = vrot.slane %v428_v2, 4  ;;  %v410_v4 = vpop.permute.xlu0 %409  ;;  %v412_v7 = vpop.permute.xlu1 %411  ;;  %v1617_v49 = vpack.c.bf16 %v985_v25, %v981_v45 }
  0xc5   : > { %v415_v8 = vsel %vm413_vm0, %v408_v0, %v410_v4  ;;  %v414_v10 = vsel %vm413_vm0, %v410_v4, %v412_v7  ;;  %v417_v14 = vsel %vm413_vm0, %v412_v7, %v406_v63 }
  0xc6   : > { %444 = vst [vmem:[#allocation4 + $0x8] sm:$0xf0] %v436_v3  ;;  %v429_v22 = vmul.f32 %v1937_v13, %v415_v8  ;;  %v427_v23 = vmul.f32 %v1932_v12, %v417_v14  ;;  %v430_v24 = vmul.f32 %v1950_v17, %v414_v10 }
  0xc7   : > { %v986_v26 = vld [vmem:[#allocation5 + $0x68] sm:$0xff]  ;;  %v988_v27 = vld [vmem:[#allocation5 + $0x78] sm:$0xff] }
  0xc8   : > { %v987_v31 = vld [vmem:[#allocation5 + $0x70] sm:$0xff]  ;;  %v437_v32 = vrot.slane %v429_v22, 4  ;;  %v435_v33 = vrot.slane %v427_v23, 4  ;;  %v438_v38 = vrot.slane %v430_v24, 4  ;;  %v478_v41 = vpop.permute.xlu0 %477  ;;  %v480_v42 = vpop.permute.xlu1 %479  ;;  %v1615_v43 = vpack.c.bf16 %v986_v26, %v982_v18 }
  0xc9   : > { %v488_v13 = vsel %vm485_vm1, %v478_v41, %v480_v42  ;;  %v1623_v12 = vpack.c.bf16 %v988_v27, %v984_v44  ;;  %v1625_v17 = vpack.c.bf16 %v987_v31, %v983_v46 }
  0xca   : > { %445 = vst [vmem:[#allocation4 + $0x10] sm:$0xf0] %v437_v32  ;;  %443 = vst [vmem:[#allocation4] sm:$0xf0] %v435_v33  ;;  %v500_v52 = vmul.f32 %v1959_v21, %v488_v13  ;;  %1616 = vmatprep.subr.bf16.mxu0 %v1615_v43 }
  0xcb   : > { %446 = vst [vmem:[#allocation4 + $0x18] sm:$0xf0] %v438_v38  ;;  %1624 = vmatprep.subr.bf16.mxu1 %v1623_v12  ;;  %1618 = vmatpush1.bf16.msra.mxu0 %v1617_v49 }
  0xcc   : > { %v508_v54 = vrot.slane %v500_v52, 4  ;;  %1626 = vmatpush1.bf16.msra.mxu1 %v1625_v17  ;;  %v482_v56 = vpop.permute.xlu0 %481  ;;  %v484_v57 = vpop.permute.xlu1 %483 }
  0xcd   : > { %v487_v58 = vsel %vm485_vm1, %v480_v42, %v482_v56  ;;  %v486_v61 = vsel %vm485_vm1, %v482_v56, %v484_v57  ;;  %v489_v62 = vsel %vm485_vm1, %v484_v57, %v478_v41  ;;  %v2215_v42 = vld [vmem:[%s2318_s0 + $0x88] sm:$0xff] }
  0xce   : > { %516 = vst [vmem:[#allocation4 + $0x28] sm:$0xf0] %v508_v54  ;;  %v501_v63 = vmul.f32 %v1981_v30, %v487_v58  ;;  %v499_v21 = vmul.f32 %v1942_v16, %v489_v62  ;;  %v502_v0 = vmul.f32 %v1990_v39, %v486_v61  ;;  %v2226_v45 = vcombine.high %v2215_v42, %v2215_v42 }
  0xd0   : > { %v509_v1 = vrot.slane %v501_v63, 4  ;;  %v507_v2 = vrot.slane %v499_v21, 4  ;;  %v510_v3 = vrot.slane %v502_v0, 4  ;;  %v375_v4 = vpop.permute.xlu0 %374  ;;  %v377_v7 = vpop.permute.xlu1 %376 }
  0xd1   : > { %v387_v8 = vsel %vm384_vm2, %v375_v4, %v377_v7 }
  0xd2   : > { %517 = vst [vmem:[#allocation4 + $0x30] sm:$0xf0] %v509_v1  ;;  %515 = vst [vmem:[#allocation4 + $0x20] sm:$0xf0] %v507_v2  ;;  %v398_v10 = vmul.f32 %v2011_v50, %v387_v8 }
  0xd3   : > { %518 = vst [vmem:[#allocation4 + $0x38] sm:$0xf0] %v510_v3 }
  0xd4   : > { %402 = vst [vmem:[#allocation4 + $0x8] sm:$0xf] %v398_v10  ;;  %v379_v14 = vpop.permute.xlu0 %378  ;;  %v381_v30 = vpop.permute.xlu1 %380 }
  0xd5   : > { %v386_v16 = vsel %vm384_vm2, %v377_v7, %v379_v14  ;;  %v385_v39 = vsel %vm384_vm2, %v379_v14, %v381_v30  ;;  %v388_v22 = vsel %vm384_vm2, %v381_v30, %v375_v4 }
  0xd6   : > { %v399_v23 = vmul.f32 %v2016_v51, %v386_v16  ;;  %v397_v24 = vmul.f32 %v1997_v40, %v388_v22  ;;  %v400_v18 = vmul.f32 %v2023_v59, %v385_v39 }
  0xd8   : > { %403 = vst [vmem:[#allocation4 + $0x10] sm:$0xf] %v399_v23  ;;  %401 = vst [vmem:[#allocation4] sm:$0xf] %v397_v24  ;;  %v448_v50 = vpop.permute.xlu0 %447  ;;  %v450_v25 = vpop.permute.xlu1 %449 }
  0xd9   : > { %404 = vst [vmem:[#allocation4 + $0x18] sm:$0xf] %v400_v18  ;;  %v458_v26 = vsel %vm455_vm3, %v448_v50, %v450_v25 }
  0xda   : > { %v470_v27 = vmul.f32 %v2042_v5, %v458_v26  ;;  %v2210_v5 = vld [vmem:[%s2318_s0 + $0x80] sm:$0xff] }
  0xdb   : > { %v2222_v44 = vcombine.high %v2210_v5, %v2210_v5  ;;  %v953_v7 = vld [vmem:[#allocation4 + $0x8] sm:$0xff] }
  0xdc   : > { %474 = vst [vmem:[#allocation4 + $0x28] sm:$0xf] %v470_v27  ;;  %v452_v31 = vpop.permute.xlu0 %451  ;;  %v454_v32 = vpop.permute.xlu1 %453 }
  0xdd   : > { %v457_v51 = vsel %vm455_vm3, %v450_v25, %v452_v31  ;;  %v456_v40 = vsel %vm455_vm3, %v452_v31, %v454_v32  ;;  %v459_v59 = vsel %vm455_vm3, %v454_v32, %v448_v50  ;;  %v972_v31 = vld [vmem:[%s1771_s11] sm:$0xff] }
  0xde   : > { %v471_v33 = vmul.f32 %v2047_v6, %v457_v51  ;;  %v469_v38 = vmul.f32 %v2028_v60, %v459_v59  ;;  %v472_v41 = vmul.f32 %v2054_v15, %v456_v40 }
  0xdf   : > { %v952_v51 = vld [vmem:[#allocation4] sm:$0xff]  ;;  %v954_v40 = vld [vmem:[#allocation4 + $0x10] sm:$0xff] }
  0xe0   : > { %475 = vst [vmem:[#allocation4 + $0x30] sm:$0xf] %v471_v33  ;;  %473 = vst [vmem:[#allocation4 + $0x20] sm:$0xf] %v469_v38  ;;  %v924_v6 = vpop.permute.xlu0 %923  ;;  %v926_v43 = vpop.permute.xlu1 %925  ;;  %v955_v30 = vld [vmem:[#allocation4 + $0x18] sm:$0xff] }
  0xe1   : > { %476 = vst [vmem:[#allocation4 + $0x38] sm:$0xf] %v472_v41  ;;  %v933_v60 = vsel %vm645_vm7, %v924_v6, %v926_v43 }
  0xe2   : > { %v943_v15 = vmul.f32 %v2210_v5, %v933_v60 }
  0xe3   : > { %v957_v1 = vld [vmem:[#allocation4 + $0x28] sm:$0xff] }
  0xe4   : > { %947 = vst [vmem:[#allocation5 + $0x80] sm:$0xf] %v943_v15  ;;  %v928_v46 = vpop.permute.xlu0 %927  ;;  %v930_v13 = vpop.permute.xlu1 %929  ;;  %v1627_v18 = vpack.c.bf16 %v957_v1, %v953_v7 }
  0xe5   : > { %v932_v12 = vsel %vm645_vm7, %v926_v43, %v928_v46  ;;  %v931_v49 = vsel %vm645_vm7, %v928_v46, %v930_v13  ;;  %v934_v17 = vsel %vm645_vm7, %v930_v13, %v924_v6 }
  0xe6   : > { %v944_v52 = vmul.f32 %v2222_v44, %v932_v12  ;;  %v945_v54 = vmul.f32 %v2215_v42, %v931_v49  ;;  %v946_v56 = vmul.f32 %v2226_v45, %v934_v17 }
  0xe7   : > { %v956_v16 = vld [vmem:[#allocation4 + $0x20] sm:$0xff]  ;;  %v958_v39 = vld [vmem:[#allocation4 + $0x30] sm:$0xff] }
  0xe8   : > { %948 = vst [vmem:[#allocation5 + $0x88] sm:$0xf] %v944_v52  ;;  %949 = vst [vmem:[#allocation5 + $0x90] sm:$0xf] %v945_v54  ;;  %v524_v57 = vpop.permute.xlu0 %523  ;;  %v526_v58 = vpop.permute.xlu1 %525  ;;  %v959_v8 = vld [vmem:[#allocation4 + $0x38] sm:$0xff]  ;;  %v1629_v33 = vpack.c.bf16 %v956_v16, %v952_v51  ;;  %v1637_v38 = vpack.c.bf16 %v958_v39, %v954_v40 }
  0xe9   : > { %950 = vst [vmem:[#allocation5 + $0x98] sm:$0xf] %v946_v56  ;;  %v534_v61 = vsel %vm531_vm4, %v524_v57, %v526_v58 }
  0xea   : > { %v545_v62 = vmul.f32 %v2069_v28, %v534_v61 }
  0xec   : > { %v553_v63 = vrot.slane %v545_v62, 4  ;;  %v528_v21 = vpop.permute.xlu0 %527  ;;  %v530_v0 = vpop.permute.xlu1 %529 }
  0xed   : > { %v533_v2 = vsel %vm531_vm4, %v526_v58, %v528_v21  ;;  %v532_v3 = vsel %vm531_vm4, %v528_v21, %v530_v0  ;;  %v535_v4 = vsel %vm531_vm4, %v530_v0, %v524_v57 }
  0xee   : > { %561 = vst [vmem:[#allocation4 + $0x40] sm:$0xf0] %v553_v63  ;;  %v546_v10 = vmul.f32 %v2085_v36, %v533_v2  ;;  %v547_v28 = vmul.f32 %v2074_v29, %v532_v3  ;;  %v548_v14 = vmul.f32 %v2081_v35, %v535_v4  ;;  %v989_v36 = vld [vmem:[#allocation5 + $0x80] sm:$0xf]  ;;  %v1635_v35 = vpack.c.bf16 %v959_v8, %v955_v30 }
  0xef   : > { %v990_v22 = vld [vmem:[#allocation5 + $0x88] sm:$0xf]  ;;  %v991_v24 = vld [vmem:[#allocation5 + $0x90] sm:$0xf] }
  0xf0   : > { %v992_v23 = vld [vmem:[#allocation5 + $0x98] sm:$0xf]  ;;  %v554_v50 = vrot.slane %v546_v10, 4  ;;  %v555_v25 = vrot.slane %v547_v28, 4  ;;  %v556_v26 = vrot.slane %v548_v14, 4  ;;  %v596_v27 = vpop.permute.xlu0 %595  ;;  %1591 = vmatprep.subr.msk.mxu0 %vm997_vm8, %v990_v22  ;;  %v598_v29 = vpop.permute.xlu1 %597 }
  0xf1   : > { %1594 = vmatprep.subr.msk.mxu1 %vm997_vm8, %v992_v23  ;;  %v606_v32 = vsel %vm603_vm5, %v596_v27, %v598_v29  ;;  %1592 = vmatpush1.msk.msra.mxu0 %vm997_vm8, %v989_v36  ;;  %v1310_v36 = vld [vmem:[%s1776_s14 + $0x8] sm:$0xff] }
  0xf2   : > { %1595 = vmatpush1.msk.msra.mxu1 %vm997_vm8, %v991_v24  ;;  %562 = vst [vmem:[#allocation4 + $0x48] sm:$0xf0] %v554_v50  ;;  %563 = vst [vmem:[#allocation4 + $0x50] sm:$0xf0] %v555_v25  ;;  %v617_v59 = vmul.f32 %v2100_v53, %v606_v32  ;;  %1628 = vmatprep.subr.bf16.mxu0 %v1627_v18 }
  0xf3   : > { %564 = vst [vmem:[#allocation4 + $0x58] sm:$0xf0] %v556_v26  ;;  %1636 = vmatprep.subr.bf16.mxu1 %v1635_v35  ;;  %1593 = vmatmul.mubr.msk.f32.vlgmr.msra.gmra.mrb[0].mxu0 %vm993_vm9, %v972_v31 }
  0xf4   : > { %1596 = vmatmul.mubr.msk.f32.vlgmr.msra.gmra.mrb[0].mxu1 %vm993_vm9, %v972_v31  ;;  %v625_v41 = vrot.slane %v617_v59, 4  ;;  %1630 = vmatpush1.bf16.msra.mxu0 %v1629_v33  ;;  %v600_v6 = vpop.permute.xlu0 %599  ;;  %v602_v43 = vpop.permute.xlu1 %601  ;;  %v1312_v31 = vld [vmem:[%s1776_s14 + $0x18] sm:$0xff] }
  0xf5   : > { %1638 = vmatpush1.bf16.msra.mxu1 %v1637_v38  ;;  %v605_v60 = vsel %vm603_vm5, %v598_v29, %v600_v6  ;;  %v604_v15 = vsel %vm603_vm5, %v600_v6, %v602_v43  ;;  %v607_v53 = vsel %vm603_vm5, %v602_v43, %v596_v27  ;;  %1231 = vmatprep.mubr.f32.mxu0 %v1710_v9  ;;  %v960_v24 = vld [vmem:[#allocation4 + $0x40] sm:$0xff]  ;;  %v1311_v29 = vld [vmem:[%s1776_s14 + $0x10] sm:$0xff] }
  0xf6   : > { %1302 = vmatprep.mubr.f32.mxu1 %v1710_v9  ;;  %633 = vst [vmem:[#allocation4 + $0x60] sm:$0xf0] %v625_v41  ;;  %v618_v46 = vmul.f32 %v2116_v20, %v605_v60  ;;  %v619_v13 = vmul.f32 %v2105_v55, %v604_v15  ;;  %v620_v12 = vmul.f32 %v2112_v19, %v607_v53  ;;  %v1309_v27 = vld [vmem:[%s1776_s14] sm:$0xff] }
  0xf8   : > { %v626_v49 = vrot.slane %v618_v46, 4  ;;  %v627_v17 = vrot.slane %v619_v13, 4  ;;  %v628_v52 = vrot.slane %v620_v12, 4  ;;  %v566_v54 = vpop.permute.xlu0 %565  ;;  %v568_v56 = vpop.permute.xlu1 %567  ;;  %v1337_v13 = vld [vmem:[#allocation3] sm:$0xff] }
  0xf9   : > { %v576_v57 = vsel %vm573_vm6, %v566_v54, %v568_v56  ;;  %v961_v7 = vld [vmem:[#allocation4 + $0x48] sm:$0xff]  ;;  %v962_v14 = vld [vmem:[#allocation4 + $0x50] sm:$0xff] }
  0xfa   : > { %634 = vst [vmem:[#allocation4 + $0x68] sm:$0xf0] %v626_v49  ;;  %635 = vst [vmem:[#allocation4 + $0x70] sm:$0xf0] %v627_v17  ;;  %v587_v9 = vmul.f32 %v2131_v34, %v576_v57  ;;  %v963_v10 = vld [vmem:[#allocation4 + $0x58] sm:$0xff] }
  0xfb   : > { %636 = vst [vmem:[#allocation4 + $0x78] sm:$0xf0] %v628_v52  ;;  %v1338_v52 = vld [vmem:[#allocation3 + $0x8] sm:$0xff] }
  0xfc   : > { %591 = vst [vmem:[#allocation4 + $0x60] sm:$0xf] %v587_v9  ;;  %v570_v58 = vpop.permute.xlu0 %569  ;;  %v572_v20 = vpop.permute.xlu1 %571 }
  0xfd   : > { %v575_v55 = vsel %vm573_vm6, %v568_v56, %v570_v58  ;;  %v574_v19 = vsel %vm573_vm6, %v570_v58, %v572_v20  ;;  %v577_v61 = vsel %vm573_vm6, %v572_v20, %v566_v54 }
  0xfe   : > { %v588_v62 = vmul.f32 %v2147_v48, %v575_v55  ;;  %v589_v63 = vmul.f32 %v2136_v37, %v574_v19  ;;  %v590_v21 = vmul.f32 %v2143_v47, %v577_v61 }
 0x100   : > { %592 = vst [vmem:[#allocation4 + $0x68] sm:$0xf] %v588_v62  ;;  %593 = vst [vmem:[#allocation4 + $0x70] sm:$0xf] %v589_v63  ;;  %v638_v34 = vpop.permute.xlu0 %637 }
 0x101   : > { %594 = vst [vmem:[#allocation4 + $0x78] sm:$0xf] %v590_v21  ;;  %v640_v0 = vpop.permute.xlu1 %639 }
 0x102   : > { %v648_v1 = vsel %vm645_vm7, %v638_v34, %v640_v0 }
 0x103   : > { %v659_v2 = vmul.f32 %v2210_v5, %v648_v1  ;;  %v964_v28 = vld [vmem:[#allocation4 + $0x60] sm:$0xff] }
 0x104   : > { %v642_v3 = vpop.permute.xlu0 %641  ;;  %v1633_v11 = vpack.c.bf16 %v964_v28, %v960_v24 }
 0x105   : > { %663 = vst [vmem:[#allocation4 + $0x80] sm:$0xf] %v659_v2  ;;  %v647_v4 = vsel %vm645_vm7, %v640_v0, %v642_v3  ;;  %v644_v48 = vpop.permute.xlu1 %643 }
 0x106   : > { %v660_v37 = vmul.f32 %v2222_v44, %v647_v4  ;;  %v646_v47 = vsel %vm645_vm7, %v642_v3, %v644_v48  ;;  %v649_v8 = vsel %vm645_vm7, %v644_v48, %v638_v34 }
 0x107   : > { %v661_v5 = vmul.f32 %v2215_v42, %v646_v47  ;;  %v662_v30 = vmul.f32 %v2226_v45, %v649_v8  ;;  %v965_v16 = vld [vmem:[#allocation4 + $0x68] sm:$0xff]  ;;  %v966_v22 = vld [vmem:[#allocation4 + $0x70] sm:$0xff]  ;;  %v951_v45 = vld [vmem:[%s1766_s8] sm:$0xff] }
 0x108   : > { %v967_v39 = vld [vmem:[#allocation4 + $0x78] sm:$0xff]  ;;  %664 = vst [vmem:[#allocation4 + $0x88] sm:$0xf] %v660_v37  ;;  %v1631_v23 = vpack.c.bf16 %v965_v16, %v961_v7  ;;  %v1641_v18 = vpack.c.bf16 %v966_v22, %v962_v14 }
 0x109   : > { %v1639_v44 = vpack.c.bf16 %v967_v39, %v963_v10  ;;  %665 = vst [vmem:[#allocation4 + $0x90] sm:$0xf] %v661_v5  ;;  %666 = vst [vmem:[#allocation4 + $0x98] sm:$0xf] %v662_v30 }
 0x10a   : > { %1632 = vmatprep.subr.bf16.mxu0 %v1631_v23 }
 0x10b   : > { %1640 = vmatprep.subr.bf16.mxu1 %v1639_v44  ;;  %1634 = vmatpush1.bf16.msra.mxu0 %v1633_v11 }
 0x10c   : > { %1642 = vmatpush1.bf16.msra.mxu1 %v1641_v18  ;;  %v968_v25 = vld [vmem:[#allocation4 + $0x80] sm:$0xf] }
 0x10f   : > { %v969_v42 = vld [vmem:[#allocation4 + $0x88] sm:$0xf] }
 0x110   : > { %1597 = vmatprep.subr.msk.mxu0 %vm997_vm8, %v969_v42  ;;  %v971_v50 = vld [vmem:[#allocation4 + $0x98] sm:$0xf]  ;;  %v970_v26 = vld [vmem:[#allocation4 + $0x90] sm:$0xf] }
 0x111   : > { %1600 = vmatprep.subr.msk.mxu1 %vm997_vm8, %v971_v50  ;;  %1598 = vmatpush1.msk.msra.mxu0 %vm997_vm8, %v968_v25 }
 0x112   : > { %1601 = vmatpush1.msk.msra.mxu1 %vm997_vm8, %v970_v26  ;;  %1599 = vmatmul.mubr.msk.f32.vlgmr.msra.gmra.mrb[0].mxu0 %vm993_vm9, %v951_v45 }
 0x113   : > { %1602 = vmatmul.mubr.msk.f32.vlgmr.msra.gmra.mrb[0].mxu1 %vm993_vm9, %v951_v45 }
 0x1e5   : > { %v1233_v35 = vpop.f32.mrb[0].mxu0 }
 0x1e6   : > { %v1313_v32 = vadd.f32 %v1309_v27, %v1233_v35  ;;  %v1304_v51 = vpop.f32.mrb[0].mxu1  ;;  %v1235_v40 = vpop.f32.mrb[1].mxu0 }
 0x1e7   : > { %v1315_v59 = vadd.f32 %v1311_v29, %v1304_v51  ;;  %v1314_v33 = vadd.f32 %v1310_v36, %v1235_v40  ;;  %v1306_v38 = vpop.f32.mrb[1].mxu1 }
 0x1e8   : > { %v1317_v41 = vmax.f32 %v1313_v32, 0.0  ;;  %v1321_v6 = vmul.f32 0.5, %v1313_v32  ;;  %v1316_v43 = vadd.f32 %v1312_v31, %v1306_v38 }
 0x1e9   : > { %v1319_v60 = vmax.f32 %v1315_v59, 0.0  ;;  %v1323_v15 = vmul.f32 0.5, %v1315_v59  ;;  %v1318_v53 = vmax.f32 %v1314_v33, 0.0  ;;  %v1322_v46 = vmul.f32 0.5, %v1314_v33 }
 0x1ea   : > { %1685 = vtanh.f32 %v1321_v6  ;;  %v1320_v12 = vmax.f32 %v1316_v43, 0.0  ;;  %v1324_v49 = vmul.f32 0.5, %v1316_v43 }
 0x1eb   : > { %1687 = vtanh.f32 %v1323_v15  ;;  %v1343_v17 = vcombine.low %v1317_v41, %v1318_v53 }
 0x1ec   : > { %1689 = vtanh.f32 %v1322_v46  ;;  %v1344_v54 = vcombine.low %v1319_v60, %v1320_v12 }
 0x1ed   : > { %v1347_v56 = vadd.f32 %v1343_v17, %v1337_v13  ;;  %1351 = vst [vmem:[%s1789_s27] sm:$0xff] %v1343_v17  ;;  %1381 = vst [vmem:[#allocation2] sm:$0xff] %v1343_v17  ;;  %1691 = vtanh.f32 %v1324_v49 }
 0x1ee   : > { %v1348_v57 = vadd.f32 %v1344_v54, %v1338_v52  ;;  %1352 = vst [vmem:[%s1789_s27 + $0x8] sm:$0xff] %v1344_v54  ;;  %1382 = vst [vmem:[#allocation2 + $0x8] sm:$0xff] %v1344_v54 }
 0x1ef   : > { %1349 = vst [vmem:[%s1784_s21] sm:$0xff] %v1347_v56  ;;  %1379 = vst [vmem:[#allocation3] sm:$0xff] %v1347_v56 }
 0x1f0   : > { %1350 = vst [vmem:[%s1784_s21 + $0x8] sm:$0xff] %v1348_v57  ;;  %1380 = vst [vmem:[#allocation3 + $0x8] sm:$0xff] %v1348_v57 }
 0x1f4   : > { %v1686_v9 = vpop.eup %1685 }
 0x1f5   : > { %v1688_v58 = vpop.eup %1687  ;;  %v1329_v20 = vadd.f32 1.0, %v1686_v9 }
 0x1f6   : > { %v1690_v55 = vpop.eup %1689  ;;  %v1331_v19 = vadd.f32 1.0, %v1688_v58 }
 0x1f7   : > { %v1692_v61 = vpop.eup %1691  ;;  %v1333_v62 = vmul.f32 0.5, %v1329_v20  ;;  %v1330_v63 = vadd.f32 1.0, %v1690_v55 }
 0x1f8   : > { %v1335_v21 = vmul.f32 0.5, %v1331_v19  ;;  %v1332_v34 = vadd.f32 1.0, %v1692_v61 }
 0x1f9   : > { %v1357_v0 = vrot.slane %v1333_v62, 4  ;;  %v1334_v1 = vmul.f32 0.5, %v1330_v63 }
 0x1fa   : > { %v1359_v2 = vrot.slane %v1335_v21, 4  ;;  %v1336_v3 = vmul.f32 0.5, %v1332_v34 }
 0x1fb   : > { %v1365_v4 = vmul.f32 %v1357_v0, %v1317_v41  ;;  %v1358_v48 = vrot.slane %v1334_v1, 4 }
 0x1fc   : > { %v1367_v7 = vmul.f32 %v1359_v2, %v1319_v60  ;;  %v1360_v37 = vrot.slane %v1336_v3, 4  ;;  %1385 = sbr.rel (%p1562_p4) target bundleno = 516 (0x204), region = 48 }
 0x1fd   : > { %v1366_v47 = vmul.f32 %v1358_v48, %v1318_v53 }
 0x1fe   : > { %v1368_v8 = vmul.f32 %v1360_v37, %v1320_v12 }
 0x1ff   : > { %v1373_v10 = vcombine.low %v1365_v4, %v1366_v47 }
 0x200   : > { %v1374_v28 = vcombine.low %v1367_v7, %v1368_v8 }
 0x201   : > { %1377 = vst [vmem:[%s1794_s28] sm:$0xff] %v1373_v10 }
 0x202   : > { %1378 = vst [vmem:[%s1794_s28 + $0x8] sm:$0xff] %v1374_v28  ;;  %1386 = vst [vmem:[%s1794_s28] sm:$0xff] (!%p1562_p4), %v1343_v17 }
 0x203   : > { %1387 = vst [vmem:[%s1794_s28 + $0x8] sm:$0xff] %v1344_v54 }
 0x204 PF: > { %s18_s24 = sadd.s32 1, %s1699_s24  }
 0x205   : > { %p15_p5 = scmp.ge.s32.totalorder %s18_s24, 6  }
 0x207   :  { %17 = sbr.rel (!%p15_p5) target bundleno = 1 (0x1), region = 118 }

</bundles_post_ra>
